<compile_context>
chip_gen: v7x
topology: tpu7x:2x2x1
jax: 0.10.0
libtpu: 0.0.40
codegen_flags: <defaults>
</compile_context>

<pallas_src>
from functools import partial

import jax
import jax.numpy as jnp
from jax.experimental import pallas as pl
from jax.experimental.pallas import tpu as pltpu

EPS = 1e-5  # RevIN eps


# ---------------------------------------------------------------------------
# Single fused kernel. No grid: everything (<100 KiB) is resident in VMEM.
# ---------------------------------------------------------------------------
def fused_forward_kernel(x_ref, xm_ref, wemb_ref, wrnn_ref, head_ref, o_ref):
    B, L, C = x_ref.shape
    F = xm_ref.shape[-1]
    NL = wrnn_ref.shape[0]
    D = wrnn_ref.shape[-1]
    P = o_ref.shape[1]
    f32 = jnp.float32

    def mm(a, w):  # 2-D MXU matmul
        return jnp.dot(a, w, preferred_element_type=f32)

    # ---- packed parameters -------------------------------------------------
    wemb = wemb_ref[...]                       # [3C+F, D]: taps (t-1, t, t+1), timeF
    w_tm1, w_t0, w_tp1 = wemb[0:C], wemb[C:2 * C], wemb[2 * C:3 * C]
    w_mark = wemb[3 * C:3 * C + F]
    wrnn = wrnn_ref[...]                       # [NL, 2D+1, D]: w_ih^T | w_hh^T | bias
    head = head_ref[...]                       # [D+3, C]: fc_w^T | fc_b | aff_w | aff_b
    fcw = head[0:D]                            # [D, C]
    fcb = head[D:D + 1][None]                  # [1, 1, C]
    aw3 = head[D + 1:D + 2][None]              # [1, 1, C]
    ab3 = head[D + 2:D + 3][None]              # [1, 1, C]

    # ---- RevIN "norm": stats over time, hoisted EUP reciprocal --------------
    x = x_ref[...]                             # [B, L, C]
    mean = jnp.mean(x, axis=1, keepdims=True)                 # [B, 1, C]
    var = jnp.mean((x - mean) ** 2, axis=1, keepdims=True)    # biased var (RevIN)
    std = jnp.sqrt(var + EPS)
    inv_std = pl.reciprocal(std, approx=True)
    xn = (x - mean) * inv_std * aw3 + ab3                     # [B, L, C]

    # ---- embedding: circular Conv1d(k=3) + timeF Linear, batched matmuls ----
    xm = xm_ref[...]                           # [B, L, F]
    # circular time shifts (padding_mode='circular'): x[t-1] and x[t+1]
    xp = jnp.concatenate([xn[:, L - 1:, :], xn[:, :L - 1, :]], axis=1)
    xf = jnp.concatenate([xn[:, 1:, :], xn[:, :1, :]], axis=1)
    acts = jnp.stack(
        [mm(xp[b], w_tm1) + mm(xn[b], w_t0) + mm(xf[b], w_tp1) + mm(xm[b], w_mark)
         for b in range(B)], axis=0)           # [B, L, D]
    # dropout: identity at inference

    # ---- multi-layer tanh RNN, h0 = 0 ---------------------------------------
    for layer in range(NL):
        wih_t = wrnn[layer, 0:D]               # [D, D]  (input->hidden, pre-transposed)
        whh_t = wrnn[layer, D:2 * D]           # [D, D]  (hidden->hidden, pre-transposed)
        b_l = wrnn[layer, 2 * D:2 * D + 1][None]      # [1, 1, D]
        # whole-sequence input projection: off the serial path, one matmul per batch
        zs = jnp.stack([mm(acts[b], wih_t) for b in range(B)], axis=0) + b_l  # [B, L, D]
        # serial recurrence: the only true critical path (NL*L small matmuls)
        # TODO(synk): on hardware where it pays off, keep whh_t resident in the MXU
        #             (pltpu.matmul_push_rhs / matmul_acc_lhs / matmul_pop).
        h = jnp.zeros((B, D), f32)
        hs = []
        for t in range(L):
            h = jnp.tanh(zs[:, t, :] + mm(h, whh_t))
            hs.append(h)
        acts = jnp.stack(hs, axis=1)           # [B, L, D] (re-stacked per layer)
        # inter-layer dropout: identity at inference

    # ---- head: fc1 on last P steps fused with RevIN "denorm", single store --
    hlast = acts[:, L - P:, :]                 # [B, P, D]
    y = jnp.stack([mm(hlast[b], fcw) for b in range(B)], axis=0) + fcb   # [B, P, C]
    inv_aw = pl.reciprocal(aw3 + EPS * EPS, approx=True)
    o_ref[...] = (y - ab3) * inv_aw * std + mean


# ---------------------------------------------------------------------------
# One-time parameter re-layout (hoisted OUT of the per-call forward).
# ---------------------------------------------------------------------------
def prepare_params(params, num_layers):
    D, C, _ = params["conv_w"].shape
    cw = params["conv_w"]                                        # [D, C, 3]
    w_emb = jnp.concatenate(
        [cw[:, :, 0].T, cw[:, :, 1].T, cw[:, :, 2].T, params["temp_w"].T],
        axis=0).astype(jnp.float32)                              # [3C+F, D]
    w_rnn = jnp.stack(
        [jnp.concatenate(
            [params["w_ih"][l].T, params["w_hh"][l].T,
             (params["b_ih"][l] + params["b_hh"][l]).reshape(1, D)], axis=0)
         for l in range(num_layers)], axis=0).astype(jnp.float32)  # [NL, 2D+1, D]
    head = jnp.concatenate(
        [params["fc_w"].T, params["fc_b"].reshape(1, C),
         params["aff_w"].reshape(1, C), params["aff_b"].reshape(1, C)],
        axis=0).astype(jnp.float32)                              # [D+3, C]
    return {"w_emb": w_emb, "w_rnn": w_rnn, "head": head}


# ---------------------------------------------------------------------------
# Forward = exactly one pallas_call (no surrounding XLA glue ops).
# ---------------------------------------------------------------------------
@partial(jax.jit, static_argnames=("pred_len",))
def forward(x, x_mark, prep, *, pred_len):
    B, _, C = x.shape
    vmem = pl.BlockSpec(memory_space=pltpu.MemorySpace.VMEM)
    return pl.pallas_call(
        fused_forward_kernel,
        out_shape=jax.ShapeDtypeStruct((B, pred_len, C), jnp.float32),
        in_specs=[vmem] * 5,
        out_specs=vmem,
    )(x, x_mark, prep["w_emb"], prep["w_rnn"], prep["head"])
    # TODO(synk): iterative=True autoregressive branch not implemented
    #             (the reference forward defaults to iterative=False).


# ---------------------------------------------------------------------------
# Pure-JAX reference (mirrors the PyTorch module) for a loose sanity check.
# ---------------------------------------------------------------------------
def reference_forward(x, x_mark, params, pred_len, num_layers):
    B, L, C = x.shape
    mean = jnp.mean(x, axis=1, keepdims=True)
    std = jnp.sqrt(jnp.var(x, axis=1, keepdims=True) + EPS)
    xn = (x - mean) / std * params["aff_w"] + params["aff_b"]
    cw = params["conv_w"]
    xp = jnp.roll(xn, 1, axis=1)
    xf = jnp.roll(xn, -1, axis=1)
    e = (jnp.einsum('blc,dc->bld', xp, cw[:, :, 0])
         + jnp.einsum('blc,dc->bld', xn, cw[:, :, 1])
         + jnp.einsum('blc,dc->bld', xf, cw[:, :, 2])
         + jnp.einsum('blf,df->bld', x_mark, params["temp_w"]))
    h_in = e
    for l in range(num_layers):
        wih, whh = params["w_ih"][l], params["w_hh"][l]
        b = params["b_ih"][l] + params["b_hh"][l]
        h = jnp.zeros((B, wih.shape[0]), jnp.float32)
        outs = []
        for t in range(L):
            h = jnp.tanh(h_in[:, t, :] @ wih.T + h @ whh.T + b)
            outs.append(h)
        h_in = jnp.stack(outs, axis=1)
    out = h_in[:, L - pred_len:, :] @ params["fc_w"].T + params["fc_b"]
    out = (out - params["aff_b"]) / (params["aff_w"] + EPS * EPS)
    return out * std + mean


if __name__ == "__main__":
    # config: enc_in = c_out = 4, d_model = 32, e_layers = 2,
    #         seq_len = 8, pred_len = 4, freq='h' -> 4 time features, revin=True
    B, L, C, F = 2, 8, 4, 4
    D, NL, P = 32, 2, 4

    key = jax.random.PRNGKey(0)
    ks = jax.random.split(key, 16)
    x = jax.random.normal(ks[0], (B, L, C), jnp.float32)
    x_mark = jax.random.normal(ks[1], (B, L, F), jnp.float32)

    params = {
        "aff_w": jnp.ones((C,), jnp.float32),          # RevIN affine_weight
        "aff_b": jnp.zeros((C,), jnp.float32),         # RevIN affine_bias
        "conv_w": 0.1 * jax.random.normal(ks[2], (D, C, 3), jnp.float32),
        "temp_w": 0.1 * jax.random.normal(ks[3], (D, F), jnp.float32),
        "w_ih": [0.1 * jax.random.normal(ks[4 + l], (D, D), jnp.float32)
                 for l in range(NL)],
        "w_hh": [0.1 * jax.random.normal(ks[6 + l], (D, D), jnp.float32)
                 for l in range(NL)],
        "b_ih": [0.05 * jax.random.normal(ks[8 + l], (D,), jnp.float32)
                 for l in range(NL)],
        "b_hh": [0.05 * jax.random.normal(ks[10 + l], (D,), jnp.float32)
                 for l in range(NL)],
        "fc_w": 0.1 * jax.random.normal(ks[12], (C, D), jnp.float32),
        "fc_b": 0.01 * jax.random.normal(ks[13], (C,), jnp.float32),
    }

    prep = prepare_params(params, NL)              # one-time weight re-layout
    out = forward(x, x_mark, prep, pred_len=P)
    out = jax.block_until_ready(out)

    assert out.shape == (B, P, C), out.shape
    assert bool(jnp.all(jnp.isfinite(out)))
    ref = reference_forward(x, x_mark, params, P, NL)
    # loose tolerance: kernel uses EUP approx reciprocals (~1e-3 rel error)
    assert bool(jnp.allclose(out, ref, rtol=5e-2, atol=5e-2)), \
        float(jnp.max(jnp.abs(out - ref)))
    print("KERNEL_OK")
</pallas_src>

<mosaic_0001>
module attributes {stable_mosaic.version = 11 : i64} {
  func.func @fused_forward_kernel(%arg0: memref<2x8x4xf32, #tpu.memory_space<vmem>>, %arg1: memref<2x8x4xf32, #tpu.memory_space<vmem>>, %arg2: memref<16x32xf32, #tpu.memory_space<vmem>>, %arg3: memref<2x65x32xf32, #tpu.memory_space<vmem>>, %arg4: memref<35x4xf32, #tpu.memory_space<vmem>>, %arg5: memref<2x4x4xf32, #tpu.memory_space<vmem>>) attributes {dimension_semantics = [], scalar_prefetch = 0 : i64, scratch_operands = 0 : i64, tpu.core_type = #tpu.core_type<tc>} {
    %c0 = arith.constant 0 : index
    %c0_0 = arith.constant 0 : index
    %0 = vector.load %arg2[%c0, %c0_0] : memref<16x32xf32, #tpu.memory_space<vmem>>, vector<16x32xf32>
    %1 = vector.extract_strided_slice %0 {offsets = [0, 0], sizes = [4, 32], strides = [1, 1]} : vector<16x32xf32> to vector<4x32xf32>
    %2 = vector.extract_strided_slice %0 {offsets = [4, 0], sizes = [4, 32], strides = [1, 1]} : vector<16x32xf32> to vector<4x32xf32>
    %3 = vector.extract_strided_slice %0 {offsets = [8, 0], sizes = [4, 32], strides = [1, 1]} : vector<16x32xf32> to vector<4x32xf32>
    %4 = vector.extract_strided_slice %0 {offsets = [12, 0], sizes = [4, 32], strides = [1, 1]} : vector<16x32xf32> to vector<4x32xf32>
    %c0_1 = arith.constant 0 : index
    %c0_2 = arith.constant 0 : index
    %c0_3 = arith.constant 0 : index
    %5 = vector.load %arg3[%c0_1, %c0_2, %c0_3] : memref<2x65x32xf32, #tpu.memory_space<vmem>>, vector<2x65x32xf32>
    %c0_4 = arith.constant 0 : index
    %c0_5 = arith.constant 0 : index
    %6 = vector.load %arg4[%c0_4, %c0_5] : memref<35x4xf32, #tpu.memory_space<vmem>>, vector<35x4xf32>
    %7 = vector.extract_strided_slice %6 {offsets = [0, 0], sizes = [32, 4], strides = [1, 1]} : vector<35x4xf32> to vector<32x4xf32>
    %8 = vector.extract_strided_slice %6 {offsets = [32, 0], sizes = [1, 4], strides = [1, 1]} : vector<35x4xf32> to vector<1x4xf32>
    %9 = vector.shape_cast %8 : vector<1x4xf32> to vector<1x1x4xf32>
    %10 = vector.extract_strided_slice %6 {offsets = [33, 0], sizes = [1, 4], strides = [1, 1]} : vector<35x4xf32> to vector<1x4xf32>
    %11 = vector.shape_cast %10 : vector<1x4xf32> to vector<1x1x4xf32>
    %12 = vector.extract_strided_slice %6 {offsets = [34, 0], sizes = [1, 4], strides = [1, 1]} : vector<35x4xf32> to vector<1x4xf32>
    %13 = vector.shape_cast %12 : vector<1x4xf32> to vector<1x1x4xf32>
    %c0_6 = arith.constant 0 : index
    %c0_7 = arith.constant 0 : index
    %c0_8 = arith.constant 0 : index
    %14 = vector.load %arg0[%c0_6, %c0_7, %c0_8] : memref<2x8x4xf32, #tpu.memory_space<vmem>>, vector<2x8x4xf32>
    %cst = arith.constant dense<0.000000e+00> : vector<2x4xf32>
    %15 = vector.multi_reduction <add>, %14, %cst [1] : vector<2x8x4xf32> to vector<2x4xf32>
    %16 = vector.shape_cast %15 : vector<2x4xf32> to vector<2x1x4xf32>
    %cst_9 = arith.constant 8.000000e+00 : f32
    %17 = vector.broadcast %cst_9 : f32 to vector<2x1x4xf32>
    %18 = arith.divf %16, %17 : vector<2x1x4xf32>
    %19 = vector.broadcast %18 : vector<2x1x4xf32> to vector<2x8x4xf32>
    %20 = arith.subf %14, %19 : vector<2x8x4xf32>
    %21 = arith.mulf %20, %20 : vector<2x8x4xf32>
    %cst_10 = arith.constant dense<0.000000e+00> : vector<2x4xf32>
    %22 = vector.multi_reduction <add>, %21, %cst_10 [1] : vector<2x8x4xf32> to vector<2x4xf32>
    %23 = vector.shape_cast %22 : vector<2x4xf32> to vector<2x1x4xf32>
    %cst_11 = arith.constant 8.000000e+00 : f32
    %24 = vector.broadcast %cst_11 : f32 to vector<2x1x4xf32>
    %25 = arith.divf %23, %24 : vector<2x1x4xf32>
    %cst_12 = arith.constant 9.99999974E-6 : f32
    %26 = vector.broadcast %cst_12 : f32 to vector<2x1x4xf32>
    %27 = arith.addf %25, %26 : vector<2x1x4xf32>
    %28 = math.sqrt %27 : vector<2x1x4xf32>
    %29 = tpu.reciprocal %28 {approx = true} : vector<2x1x4xf32> -> vector<2x1x4xf32>
    %30 = vector.broadcast %18 : vector<2x1x4xf32> to vector<2x8x4xf32>
    %31 = arith.subf %14, %30 : vector<2x8x4xf32>
    %32 = vector.broadcast %29 : vector<2x1x4xf32> to vector<2x8x4xf32>
    %33 = arith.mulf %31, %32 : vector<2x8x4xf32>
    %34 = vector.broadcast %11 : vector<1x1x4xf32> to vector<2x8x4xf32>
    %35 = arith.mulf %33, %34 : vector<2x8x4xf32>
    %36 = vector.broadcast %13 : vector<1x1x4xf32> to vector<2x8x4xf32>
    %37 = arith.addf %35, %36 : vector<2x8x4xf32>
    %c0_13 = arith.constant 0 : index
    %c0_14 = arith.constant 0 : index
    %c0_15 = arith.constant 0 : index
    %38 = vector.load %arg1[%c0_13, %c0_14, %c0_15] : memref<2x8x4xf32, #tpu.memory_space<vmem>>, vector<2x8x4xf32>
    %39 = vector.extract_strided_slice %37 {offsets = [0, 7, 0], sizes = [2, 1, 4], strides = [1, 1, 1]} : vector<2x8x4xf32> to vector<2x1x4xf32>
    %40 = vector.extract_strided_slice %37 {offsets = [0, 0, 0], sizes = [2, 7, 4], strides = [1, 1, 1]} : vector<2x8x4xf32> to vector<2x7x4xf32>
    %41 = tpu.concatenate %39, %40 in 1 : vector<2x1x4xf32>, vector<2x7x4xf32> -> vector<2x8x4xf32>
    %42 = vector.extract_strided_slice %37 {offsets = [0, 1, 0], sizes = [2, 7, 4], strides = [1, 1, 1]} : vector<2x8x4xf32> to vector<2x7x4xf32>
    %43 = vector.extract_strided_slice %37 {offsets = [0, 0, 0], sizes = [2, 1, 4], strides = [1, 1, 1]} : vector<2x8x4xf32> to vector<2x1x4xf32>
    %44 = tpu.concatenate %42, %43 in 1 : vector<2x7x4xf32>, vector<2x1x4xf32> -> vector<2x8x4xf32>
    %45 = vector.extract_strided_slice %41 {offsets = [0, 0, 0], sizes = [1, 8, 4], strides = [1, 1, 1]} : vector<2x8x4xf32> to vector<1x8x4xf32>
    %46 = vector.shape_cast %45 : vector<1x8x4xf32> to vector<8x4xf32>
    %cst_16 = arith.constant dense<0.000000e+00> : vector<8x32xf32>
    %47 = tpu.matmul %46, %1, %cst_16 {dimension_numbers = #tpu.dot_dimension_numbers<[1], [0], [0], [1], [0, 0, 1, 1], [], []>} : vector<8x4xf32>, vector<4x32xf32>, vector<8x32xf32> -> vector<8x32xf32>
    %48 = vector.extract_strided_slice %37 {offsets = [0, 0, 0], sizes = [1, 8, 4], strides = [1, 1, 1]} : vector<2x8x4xf32> to vector<1x8x4xf32>
    %49 = vector.shape_cast %48 : vector<1x8x4xf32> to vector<8x4xf32>
    %cst_17 = arith.constant dense<0.000000e+00> : vector<8x32xf32>
    %50 = tpu.matmul %49, %2, %cst_17 {dimension_numbers = #tpu.dot_dimension_numbers<[1], [0], [0], [1], [0, 0, 1, 1], [], []>} : vector<8x4xf32>, vector<4x32xf32>, vector<8x32xf32> -> vector<8x32xf32>
    %51 = arith.addf %47, %50 : vector<8x32xf32>
    %52 = vector.extract_strided_slice %44 {offsets = [0, 0, 0], sizes = [1, 8, 4], strides = [1, 1, 1]} : vector<2x8x4xf32> to vector<1x8x4xf32>
    %53 = vector.shape_cast %52 : vector<1x8x4xf32> to vector<8x4xf32>
    %cst_18 = arith.constant dense<0.000000e+00> : vector<8x32xf32>
    %54 = tpu.matmul %53, %3, %cst_18 {dimension_numbers = #tpu.dot_dimension_numbers<[1], [0], [0], [1], [0, 0, 1, 1], [], []>} : vector<8x4xf32>, vector<4x32xf32>, vector<8x32xf32> -> vector<8x32xf32>
    %55 = arith.addf %51, %54 : vector<8x32xf32>
    %56 = vector.extract_strided_slice %38 {offsets = [0, 0, 0], sizes = [1, 8, 4], strides = [1, 1, 1]} : vector<2x8x4xf32> to vector<1x8x4xf32>
    %57 = vector.shape_cast %56 : vector<1x8x4xf32> to vector<8x4xf32>
    %cst_19 = arith.constant dense<0.000000e+00> : vector<8x32xf32>
    %58 = tpu.matmul %57, %4, %cst_19 {dimension_numbers = #tpu.dot_dimension_numbers<[1], [0], [0], [1], [0, 0, 1, 1], [], []>} : vector<8x4xf32>, vector<4x32xf32>, vector<8x32xf32> -> vector<8x32xf32>
    %59 = arith.addf %55, %58 : vector<8x32xf32>
    %60 = vector.extract_strided_slice %41 {offsets = [1, 0, 0], sizes = [1, 8, 4], strides = [1, 1, 1]} : vector<2x8x4xf32> to vector<1x8x4xf32>
    %61 = vector.shape_cast %60 : vector<1x8x4xf32> to vector<8x4xf32>
    %cst_20 = arith.constant dense<0.000000e+00> : vector<8x32xf32>
    %62 = tpu.matmul %61, %1, %cst_20 {dimension_numbers = #tpu.dot_dimension_numbers<[1], [0], [0], [1], [0, 0, 1, 1], [], []>} : vector<8x4xf32>, vector<4x32xf32>, vector<8x32xf32> -> vector<8x32xf32>
    %63 = vector.extract_strided_slice %37 {offsets = [1, 0, 0], sizes = [1, 8, 4], strides = [1, 1, 1]} : vector<2x8x4xf32> to vector<1x8x4xf32>
    %64 = vector.shape_cast %63 : vector<1x8x4xf32> to vector<8x4xf32>
    %cst_21 = arith.constant dense<0.000000e+00> : vector<8x32xf32>
    %65 = tpu.matmul %64, %2, %cst_21 {dimension_numbers = #tpu.dot_dimension_numbers<[1], [0], [0], [1], [0, 0, 1, 1], [], []>} : vector<8x4xf32>, vector<4x32xf32>, vector<8x32xf32> -> vector<8x32xf32>
    %66 = arith.addf %62, %65 : vector<8x32xf32>
    %67 = vector.extract_strided_slice %44 {offsets = [1, 0, 0], sizes = [1, 8, 4], strides = [1, 1, 1]} : vector<2x8x4xf32> to vector<1x8x4xf32>
    %68 = vector.shape_cast %67 : vector<1x8x4xf32> to vector<8x4xf32>
    %cst_22 = arith.constant dense<0.000000e+00> : vector<8x32xf32>
    %69 = tpu.matmul %68, %3, %cst_22 {dimension_numbers = #tpu.dot_dimension_numbers<[1], [0], [0], [1], [0, 0, 1, 1], [], []>} : vector<8x4xf32>, vector<4x32xf32>, vector<8x32xf32> -> vector<8x32xf32>
    %70 = arith.addf %66, %69 : vector<8x32xf32>
    %71 = vector.extract_strided_slice %38 {offsets = [1, 0, 0], sizes = [1, 8, 4], strides = [1, 1, 1]} : vector<2x8x4xf32> to vector<1x8x4xf32>
    %72 = vector.shape_cast %71 : vector<1x8x4xf32> to vector<8x4xf32>
    %cst_23 = arith.constant dense<0.000000e+00> : vector<8x32xf32>
    %73 = tpu.matmul %72, %4, %cst_23 {dimension_numbers = #tpu.dot_dimension_numbers<[1], [0], [0], [1], [0, 0, 1, 1], [], []>} : vector<8x4xf32>, vector<4x32xf32>, vector<8x32xf32> -> vector<8x32xf32>
    %74 = arith.addf %70, %73 : vector<8x32xf32>
    %75 = vector.shape_cast %59 : vector<8x32xf32> to vector<1x8x32xf32>
    %76 = vector.shape_cast %74 : vector<8x32xf32> to vector<1x8x32xf32>
    %77 = tpu.concatenate %75, %76 in 0 : vector<1x8x32xf32>, vector<1x8x32xf32> -> vector<2x8x32xf32>
    %78 = vector.extract_strided_slice %5 {offsets = [0, 0, 0], sizes = [1, 32, 32], strides = [1, 1, 1]} : vector<2x65x32xf32> to vector<1x32x32xf32>
    %79 = vector.shape_cast %78 : vector<1x32x32xf32> to vector<32x32xf32>
    %80 = vector.extract_strided_slice %5 {offsets = [0, 32, 0], sizes = [1, 32, 32], strides = [1, 1, 1]} : vector<2x65x32xf32> to vector<1x32x32xf32>
    %81 = vector.shape_cast %80 : vector<1x32x32xf32> to vector<32x32xf32>
    %82 = vector.extract_strided_slice %5 {offsets = [0, 64, 0], sizes = [1, 1, 32], strides = [1, 1, 1]} : vector<2x65x32xf32> to vector<1x1x32xf32>
    %83 = vector.shape_cast %82 : vector<1x1x32xf32> to vector<1x32xf32>
    %84 = vector.shape_cast %83 : vector<1x32xf32> to vector<1x1x32xf32>
    %85 = vector.extract_strided_slice %77 {offsets = [0, 0, 0], sizes = [1, 8, 32], strides = [1, 1, 1]} : vector<2x8x32xf32> to vector<1x8x32xf32>
    %86 = vector.shape_cast %85 : vector<1x8x32xf32> to vector<8x32xf32>
    %cst_24 = arith.constant dense<0.000000e+00> : vector<8x32xf32>
    %87 = tpu.matmul %86, %79, %cst_24 {dimension_numbers = #tpu.dot_dimension_numbers<[1], [0], [0], [1], [0, 0, 1, 1], [], []>} : vector<8x32xf32>, vector<32x32xf32>, vector<8x32xf32> -> vector<8x32xf32>
    %88 = vector.extract_strided_slice %77 {offsets = [1, 0, 0], sizes = [1, 8, 32], strides = [1, 1, 1]} : vector<2x8x32xf32> to vector<1x8x32xf32>
    %89 = vector.shape_cast %88 : vector<1x8x32xf32> to vector<8x32xf32>
    %cst_25 = arith.constant dense<0.000000e+00> : vector<8x32xf32>
    %90 = tpu.matmul %89, %79, %cst_25 {dimension_numbers = #tpu.dot_dimension_numbers<[1], [0], [0], [1], [0, 0, 1, 1], [], []>} : vector<8x32xf32>, vector<32x32xf32>, vector<8x32xf32> -> vector<8x32xf32>
    %91 = vector.shape_cast %87 : vector<8x32xf32> to vector<1x8x32xf32>
    %92 = vector.shape_cast %90 : vector<8x32xf32> to vector<1x8x32xf32>
    %93 = tpu.concatenate %91, %92 in 0 : vector<1x8x32xf32>, vector<1x8x32xf32> -> vector<2x8x32xf32>
    %94 = vector.broadcast %84 : vector<1x1x32xf32> to vector<2x8x32xf32>
    %95 = arith.addf %93, %94 : vector<2x8x32xf32>
    %cst_26 = arith.constant 0.000000e+00 : f32
    %96 = vector.broadcast %cst_26 : f32 to vector<2x32xf32>
    %97 = vector.extract_strided_slice %95 {offsets = [0, 0, 0], sizes = [2, 1, 32], strides = [1, 1, 1]} : vector<2x8x32xf32> to vector<2x1x32xf32>
    %98 = vector.shape_cast %97 : vector<2x1x32xf32> to vector<2x32xf32>
    %cst_27 = arith.constant dense<0.000000e+00> : vector<2x32xf32>
    %99 = tpu.matmul %96, %81, %cst_27 {dimension_numbers = #tpu.dot_dimension_numbers<[1], [0], [0], [1], [0, 0, 1, 1], [], []>} : vector<2x32xf32>, vector<32x32xf32>, vector<2x32xf32> -> vector<2x32xf32>
    %100 = arith.addf %98, %99 : vector<2x32xf32>
    %101 = math.tanh %100 : vector<2x32xf32>
    %102 = vector.extract_strided_slice %95 {offsets = [0, 1, 0], sizes = [2, 1, 32], strides = [1, 1, 1]} : vector<2x8x32xf32> to vector<2x1x32xf32>
    %103 = vector.shape_cast %102 : vector<2x1x32xf32> to vector<2x32xf32>
    %cst_28 = arith.constant dense<0.000000e+00> : vector<2x32xf32>
    %104 = tpu.matmul %101, %81, %cst_28 {dimension_numbers = #tpu.dot_dimension_numbers<[1], [0], [0], [1], [0, 0, 1, 1], [], []>} : vector<2x32xf32>, vector<32x32xf32>, vector<2x32xf32> -> vector<2x32xf32>
    %105 = arith.addf %103, %104 : vector<2x32xf32>
    %106 = math.tanh %105 : vector<2x32xf32>
    %107 = vector.extract_strided_slice %95 {offsets = [0, 2, 0], sizes = [2, 1, 32], strides = [1, 1, 1]} : vector<2x8x32xf32> to vector<2x1x32xf32>
    %108 = vector.shape_cast %107 : vector<2x1x32xf32> to vector<2x32xf32>
    %cst_29 = arith.constant dense<0.000000e+00> : vector<2x32xf32>
    %109 = tpu.matmul %106, %81, %cst_29 {dimension_numbers = #tpu.dot_dimension_numbers<[1], [0], [0], [1], [0, 0, 1, 1], [], []>} : vector<2x32xf32>, vector<32x32xf32>, vector<2x32xf32> -> vector<2x32xf32>
    %110 = arith.addf %108, %109 : vector<2x32xf32>
    %111 = math.tanh %110 : vector<2x32xf32>
    %112 = vector.extract_strided_slice %95 {offsets = [0, 3, 0], sizes = [2, 1, 32], strides = [1, 1, 1]} : vector<2x8x32xf32> to vector<2x1x32xf32>
    %113 = vector.shape_cast %112 : vector<2x1x32xf32> to vector<2x32xf32>
    %cst_30 = arith.constant dense<0.000000e+00> : vector<2x32xf32>
    %114 = tpu.matmul %111, %81, %cst_30 {dimension_numbers = #tpu.dot_dimension_numbers<[1], [0], [0], [1], [0, 0, 1, 1], [], []>} : vector<2x32xf32>, vector<32x32xf32>, vector<2x32xf32> -> vector<2x32xf32>
    %115 = arith.addf %113, %114 : vector<2x32xf32>
    %116 = math.tanh %115 : vector<2x32xf32>
    %117 = vector.extract_strided_slice %95 {offsets = [0, 4, 0], sizes = [2, 1, 32], strides = [1, 1, 1]} : vector<2x8x32xf32> to vector<2x1x32xf32>
    %118 = vector.shape_cast %117 : vector<2x1x32xf32> to vector<2x32xf32>
    %cst_31 = arith.constant dense<0.000000e+00> : vector<2x32xf32>
    %119 = tpu.matmul %116, %81, %cst_31 {dimension_numbers = #tpu.dot_dimension_numbers<[1], [0], [0], [1], [0, 0, 1, 1], [], []>} : vector<2x32xf32>, vector<32x32xf32>, vector<2x32xf32> -> vector<2x32xf32>
    %120 = arith.addf %118, %119 : vector<2x32xf32>
    %121 = math.tanh %120 : vector<2x32xf32>
    %122 = vector.extract_strided_slice %95 {offsets = [0, 5, 0], sizes = [2, 1, 32], strides = [1, 1, 1]} : vector<2x8x32xf32> to vector<2x1x32xf32>
    %123 = vector.shape_cast %122 : vector<2x1x32xf32> to vector<2x32xf32>
    %cst_32 = arith.constant dense<0.000000e+00> : vector<2x32xf32>
    %124 = tpu.matmul %121, %81, %cst_32 {dimension_numbers = #tpu.dot_dimension_numbers<[1], [0], [0], [1], [0, 0, 1, 1], [], []>} : vector<2x32xf32>, vector<32x32xf32>, vector<2x32xf32> -> vector<2x32xf32>
    %125 = arith.addf %123, %124 : vector<2x32xf32>
    %126 = math.tanh %125 : vector<2x32xf32>
    %127 = vector.extract_strided_slice %95 {offsets = [0, 6, 0], sizes = [2, 1, 32], strides = [1, 1, 1]} : vector<2x8x32xf32> to vector<2x1x32xf32>
    %128 = vector.shape_cast %127 : vector<2x1x32xf32> to vector<2x32xf32>
    %cst_33 = arith.constant dense<0.000000e+00> : vector<2x32xf32>
    %129 = tpu.matmul %126, %81, %cst_33 {dimension_numbers = #tpu.dot_dimension_numbers<[1], [0], [0], [1], [0, 0, 1, 1], [], []>} : vector<2x32xf32>, vector<32x32xf32>, vector<2x32xf32> -> vector<2x32xf32>
    %130 = arith.addf %128, %129 : vector<2x32xf32>
    %131 = math.tanh %130 : vector<2x32xf32>
    %132 = vector.extract_strided_slice %95 {offsets = [0, 7, 0], sizes = [2, 1, 32], strides = [1, 1, 1]} : vector<2x8x32xf32> to vector<2x1x32xf32>
    %133 = vector.shape_cast %132 : vector<2x1x32xf32> to vector<2x32xf32>
    %cst_34 = arith.constant dense<0.000000e+00> : vector<2x32xf32>
    %134 = tpu.matmul %131, %81, %cst_34 {dimension_numbers = #tpu.dot_dimension_numbers<[1], [0], [0], [1], [0, 0, 1, 1], [], []>} : vector<2x32xf32>, vector<32x32xf32>, vector<2x32xf32> -> vector<2x32xf32>
    %135 = arith.addf %133, %134 : vector<2x32xf32>
    %136 = math.tanh %135 : vector<2x32xf32>
    %137 = vector.shape_cast %101 : vector<2x32xf32> to vector<2x1x32xf32>
    %138 = vector.shape_cast %106 : vector<2x32xf32> to vector<2x1x32xf32>
    %139 = vector.shape_cast %111 : vector<2x32xf32> to vector<2x1x32xf32>
    %140 = vector.shape_cast %116 : vector<2x32xf32> to vector<2x1x32xf32>
    %141 = vector.shape_cast %121 : vector<2x32xf32> to vector<2x1x32xf32>
    %142 = vector.shape_cast %126 : vector<2x32xf32> to vector<2x1x32xf32>
    %143 = vector.shape_cast %131 : vector<2x32xf32> to vector<2x1x32xf32>
    %144 = vector.shape_cast %136 : vector<2x32xf32> to vector<2x1x32xf32>
    %145 = tpu.concatenate %137, %138, %139, %140, %141, %142, %143, %144 in 1 : vector<2x1x32xf32>, vector<2x1x32xf32>, vector<2x1x32xf32>, vector<2x1x32xf32>, vector<2x1x32xf32>, vector<2x1x32xf32>, vector<2x1x32xf32>, vector<2x1x32xf32> -> vector<2x8x32xf32>
    %146 = vector.extract_strided_slice %5 {offsets = [1, 0, 0], sizes = [1, 32, 32], strides = [1, 1, 1]} : vector<2x65x32xf32> to vector<1x32x32xf32>
    %147 = vector.shape_cast %146 : vector<1x32x32xf32> to vector<32x32xf32>
    %148 = vector.extract_strided_slice %5 {offsets = [1, 32, 0], sizes = [1, 32, 32], strides = [1, 1, 1]} : vector<2x65x32xf32> to vector<1x32x32xf32>
    %149 = vector.shape_cast %148 : vector<1x32x32xf32> to vector<32x32xf32>
    %150 = vector.extract_strided_slice %5 {offsets = [1, 64, 0], sizes = [1, 1, 32], strides = [1, 1, 1]} : vector<2x65x32xf32> to vector<1x1x32xf32>
    %151 = vector.shape_cast %150 : vector<1x1x32xf32> to vector<1x32xf32>
    %152 = vector.shape_cast %151 : vector<1x32xf32> to vector<1x1x32xf32>
    %153 = vector.extract_strided_slice %145 {offsets = [0, 0, 0], sizes = [1, 8, 32], strides = [1, 1, 1]} : vector<2x8x32xf32> to vector<1x8x32xf32>
    %154 = vector.shape_cast %153 : vector<1x8x32xf32> to vector<8x32xf32>
    %cst_35 = arith.constant dense<0.000000e+00> : vector<8x32xf32>
    %155 = tpu.matmul %154, %147, %cst_35 {dimension_numbers = #tpu.dot_dimension_numbers<[1], [0], [0], [1], [0, 0, 1, 1], [], []>} : vector<8x32xf32>, vector<32x32xf32>, vector<8x32xf32> -> vector<8x32xf32>
    %156 = vector.extract_strided_slice %145 {offsets = [1, 0, 0], sizes = [1, 8, 32], strides = [1, 1, 1]} : vector<2x8x32xf32> to vector<1x8x32xf32>
    %157 = vector.shape_cast %156 : vector<1x8x32xf32> to vector<8x32xf32>
    %cst_36 = arith.constant dense<0.000000e+00> : vector<8x32xf32>
    %158 = tpu.matmul %157, %147, %cst_36 {dimension_numbers = #tpu.dot_dimension_numbers<[1], [0], [0], [1], [0, 0, 1, 1], [], []>} : vector<8x32xf32>, vector<32x32xf32>, vector<8x32xf32> -> vector<8x32xf32>
    %159 = vector.shape_cast %155 : vector<8x32xf32> to vector<1x8x32xf32>
    %160 = vector.shape_cast %158 : vector<8x32xf32> to vector<1x8x32xf32>
    %161 = tpu.concatenate %159, %160 in 0 : vector<1x8x32xf32>, vector<1x8x32xf32> -> vector<2x8x32xf32>
    %162 = vector.broadcast %152 : vector<1x1x32xf32> to vector<2x8x32xf32>
    %163 = arith.addf %161, %162 : vector<2x8x32xf32>
    %cst_37 = arith.constant 0.000000e+00 : f32
    %164 = vector.broadcast %cst_37 : f32 to vector<2x32xf32>
    %165 = vector.extract_strided_slice %163 {offsets = [0, 0, 0], sizes = [2, 1, 32], strides = [1, 1, 1]} : vector<2x8x32xf32> to vector<2x1x32xf32>
    %166 = vector.shape_cast %165 : vector<2x1x32xf32> to vector<2x32xf32>
    %cst_38 = arith.constant dense<0.000000e+00> : vector<2x32xf32>
    %167 = tpu.matmul %164, %149, %cst_38 {dimension_numbers = #tpu.dot_dimension_numbers<[1], [0], [0], [1], [0, 0, 1, 1], [], []>} : vector<2x32xf32>, vector<32x32xf32>, vector<2x32xf32> -> vector<2x32xf32>
    %168 = arith.addf %166, %167 : vector<2x32xf32>
    %169 = math.tanh %168 : vector<2x32xf32>
    %170 = vector.extract_strided_slice %163 {offsets = [0, 1, 0], sizes = [2, 1, 32], strides = [1, 1, 1]} : vector<2x8x32xf32> to vector<2x1x32xf32>
    %171 = vector.shape_cast %170 : vector<2x1x32xf32> to vector<2x32xf32>
    %cst_39 = arith.constant dense<0.000000e+00> : vector<2x32xf32>
    %172 = tpu.matmul %169, %149, %cst_39 {dimension_numbers = #tpu.dot_dimension_numbers<[1], [0], [0], [1], [0, 0, 1, 1], [], []>} : vector<2x32xf32>, vector<32x32xf32>, vector<2x32xf32> -> vector<2x32xf32>
    %173 = arith.addf %171, %172 : vector<2x32xf32>
    %174 = math.tanh %173 : vector<2x32xf32>
    %175 = vector.extract_strided_slice %163 {offsets = [0, 2, 0], sizes = [2, 1, 32], strides = [1, 1, 1]} : vector<2x8x32xf32> to vector<2x1x32xf32>
    %176 = vector.shape_cast %175 : vector<2x1x32xf32> to vector<2x32xf32>
    %cst_40 = arith.constant dense<0.000000e+00> : vector<2x32xf32>
    %177 = tpu.matmul %174, %149, %cst_40 {dimension_numbers = #tpu.dot_dimension_numbers<[1], [0], [0], [1], [0, 0, 1, 1], [], []>} : vector<2x32xf32>, vector<32x32xf32>, vector<2x32xf32> -> vector<2x32xf32>
    %178 = arith.addf %176, %177 : vector<2x32xf32>
    %179 = math.tanh %178 : vector<2x32xf32>
    %180 = vector.extract_strided_slice %163 {offsets = [0, 3, 0], sizes = [2, 1, 32], strides = [1, 1, 1]} : vector<2x8x32xf32> to vector<2x1x32xf32>
    %181 = vector.shape_cast %180 : vector<2x1x32xf32> to vector<2x32xf32>
    %cst_41 = arith.constant dense<0.000000e+00> : vector<2x32xf32>
    %182 = tpu.matmul %179, %149, %cst_41 {dimension_numbers = #tpu.dot_dimension_numbers<[1], [0], [0], [1], [0, 0, 1, 1], [], []>} : vector<2x32xf32>, vector<32x32xf32>, vector<2x32xf32> -> vector<2x32xf32>
    %183 = arith.addf %181, %182 : vector<2x32xf32>
    %184 = math.tanh %183 : vector<2x32xf32>
    %185 = vector.extract_strided_slice %163 {offsets = [0, 4, 0], sizes = [2, 1, 32], strides = [1, 1, 1]} : vector<2x8x32xf32> to vector<2x1x32xf32>
    %186 = vector.shape_cast %185 : vector<2x1x32xf32> to vector<2x32xf32>
    %cst_42 = arith.constant dense<0.000000e+00> : vector<2x32xf32>
    %187 = tpu.matmul %184, %149, %cst_42 {dimension_numbers = #tpu.dot_dimension_numbers<[1], [0], [0], [1], [0, 0, 1, 1], [], []>} : vector<2x32xf32>, vector<32x32xf32>, vector<2x32xf32> -> vector<2x32xf32>
    %188 = arith.addf %186, %187 : vector<2x32xf32>
    %189 = math.tanh %188 : vector<2x32xf32>
    %190 = vector.extract_strided_slice %163 {offsets = [0, 5, 0], sizes = [2, 1, 32], strides = [1, 1, 1]} : vector<2x8x32xf32> to vector<2x1x32xf32>
    %191 = vector.shape_cast %190 : vector<2x1x32xf32> to vector<2x32xf32>
    %cst_43 = arith.constant dense<0.000000e+00> : vector<2x32xf32>
    %192 = tpu.matmul %189, %149, %cst_43 {dimension_numbers = #tpu.dot_dimension_numbers<[1], [0], [0], [1], [0, 0, 1, 1], [], []>} : vector<2x32xf32>, vector<32x32xf32>, vector<2x32xf32> -> vector<2x32xf32>
    %193 = arith.addf %191, %192 : vector<2x32xf32>
    %194 = math.tanh %193 : vector<2x32xf32>
    %195 = vector.extract_strided_slice %163 {offsets = [0, 6, 0], sizes = [2, 1, 32], strides = [1, 1, 1]} : vector<2x8x32xf32> to vector<2x1x32xf32>
    %196 = vector.shape_cast %195 : vector<2x1x32xf32> to vector<2x32xf32>
    %cst_44 = arith.constant dense<0.000000e+00> : vector<2x32xf32>
    %197 = tpu.matmul %194, %149, %cst_44 {dimension_numbers = #tpu.dot_dimension_numbers<[1], [0], [0], [1], [0, 0, 1, 1], [], []>} : vector<2x32xf32>, vector<32x32xf32>, vector<2x32xf32> -> vector<2x32xf32>
    %198 = arith.addf %196, %197 : vector<2x32xf32>
    %199 = math.tanh %198 : vector<2x32xf32>
    %200 = vector.extract_strided_slice %163 {offsets = [0, 7, 0], sizes = [2, 1, 32], strides = [1, 1, 1]} : vector<2x8x32xf32> to vector<2x1x32xf32>
    %201 = vector.shape_cast %200 : vector<2x1x32xf32> to vector<2x32xf32>
    %cst_45 = arith.constant dense<0.000000e+00> : vector<2x32xf32>
    %202 = tpu.matmul %199, %149, %cst_45 {dimension_numbers = #tpu.dot_dimension_numbers<[1], [0], [0], [1], [0, 0, 1, 1], [], []>} : vector<2x32xf32>, vector<32x32xf32>, vector<2x32xf32> -> vector<2x32xf32>
    %203 = arith.addf %201, %202 : vector<2x32xf32>
    %204 = math.tanh %203 : vector<2x32xf32>
    %205 = vector.shape_cast %169 : vector<2x32xf32> to vector<2x1x32xf32>
    %206 = vector.shape_cast %174 : vector<2x32xf32> to vector<2x1x32xf32>
    %207 = vector.shape_cast %179 : vector<2x32xf32> to vector<2x1x32xf32>
    %208 = vector.shape_cast %184 : vector<2x32xf32> to vector<2x1x32xf32>
    %209 = vector.shape_cast %189 : vector<2x32xf32> to vector<2x1x32xf32>
    %210 = vector.shape_cast %194 : vector<2x32xf32> to vector<2x1x32xf32>
    %211 = vector.shape_cast %199 : vector<2x32xf32> to vector<2x1x32xf32>
    %212 = vector.shape_cast %204 : vector<2x32xf32> to vector<2x1x32xf32>
    %213 = tpu.concatenate %205, %206, %207, %208, %209, %210, %211, %212 in 1 : vector<2x1x32xf32>, vector<2x1x32xf32>, vector<2x1x32xf32>, vector<2x1x32xf32>, vector<2x1x32xf32>, vector<2x1x32xf32>, vector<2x1x32xf32>, vector<2x1x32xf32> -> vector<2x8x32xf32>
    %214 = vector.extract_strided_slice %213 {offsets = [0, 4, 0], sizes = [2, 4, 32], strides = [1, 1, 1]} : vector<2x8x32xf32> to vector<2x4x32xf32>
    %215 = vector.extract_strided_slice %214 {offsets = [0, 0, 0], sizes = [1, 4, 32], strides = [1, 1, 1]} : vector<2x4x32xf32> to vector<1x4x32xf32>
    %216 = vector.shape_cast %215 : vector<1x4x32xf32> to vector<4x32xf32>
    %cst_46 = arith.constant dense<0.000000e+00> : vector<4x4xf32>
    %217 = tpu.matmul %216, %7, %cst_46 {dimension_numbers = #tpu.dot_dimension_numbers<[1], [0], [0], [1], [0, 0, 1, 1], [], []>} : vector<4x32xf32>, vector<32x4xf32>, vector<4x4xf32> -> vector<4x4xf32>
    %218 = vector.extract_strided_slice %214 {offsets = [1, 0, 0], sizes = [1, 4, 32], strides = [1, 1, 1]} : vector<2x4x32xf32> to vector<1x4x32xf32>
    %219 = vector.shape_cast %218 : vector<1x4x32xf32> to vector<4x32xf32>
    %cst_47 = arith.constant dense<0.000000e+00> : vector<4x4xf32>
    %220 = tpu.matmul %219, %7, %cst_47 {dimension_numbers = #tpu.dot_dimension_numbers<[1], [0], [0], [1], [0, 0, 1, 1], [], []>} : vector<4x32xf32>, vector<32x4xf32>, vector<4x4xf32> -> vector<4x4xf32>
    %221 = vector.shape_cast %217 : vector<4x4xf32> to vector<1x4x4xf32>
    %222 = vector.shape_cast %220 : vector<4x4xf32> to vector<1x4x4xf32>
    %223 = tpu.concatenate %221, %222 in 0 : vector<1x4x4xf32>, vector<1x4x4xf32> -> vector<2x4x4xf32>
    %224 = vector.broadcast %9 : vector<1x1x4xf32> to vector<2x4x4xf32>
    %225 = arith.addf %223, %224 : vector<2x4x4xf32>
    %cst_48 = arith.constant 1.000000e-10 : f32
    %226 = vector.broadcast %cst_48 : f32 to vector<1x1x4xf32>
    %227 = arith.addf %11, %226 : vector<1x1x4xf32>
    %228 = tpu.reciprocal %227 {approx = true} : vector<1x1x4xf32> -> vector<1x1x4xf32>
    %229 = vector.broadcast %13 : vector<1x1x4xf32> to vector<2x4x4xf32>
    %230 = arith.subf %225, %229 : vector<2x4x4xf32>
    %231 = vector.broadcast %228 : vector<1x1x4xf32> to vector<2x4x4xf32>
    %232 = arith.mulf %230, %231 : vector<2x4x4xf32>
    %233 = vector.broadcast %28 : vector<2x1x4xf32> to vector<2x4x4xf32>
    %234 = arith.mulf %232, %233 : vector<2x4x4xf32>
    %235 = vector.broadcast %18 : vector<2x1x4xf32> to vector<2x4x4xf32>
    %236 = arith.addf %234, %235 : vector<2x4x4xf32>
    %c0_49 = arith.constant 0 : index
    %c0_50 = arith.constant 0 : index
    %c0_51 = arith.constant 0 : index
    %237 = vector.load %arg5[%c0_49, %c0_50, %c0_51] : memref<2x4x4xf32, #tpu.memory_space<vmem>>, vector<2x4x4xf32>
    tpu.vector_store %arg5[%c0_49, %c0_50, %c0_51], %236 {strides = array<i32>} : memref<2x4x4xf32, #tpu.memory_space<vmem>>, vector<2x4x4xf32>,
    return
  }
}

</mosaic_0001>

<bundles_post_ra>
// kernel: forward.1
= control target key start
LH: loop header
LB: loop body
LE: loop exit
PB: predicated region body
PF: predicated region fallthrough
CT: control target
= control target key end

     0   :  { %vm140_vm0 = vcmask 1043456   ;;  %v3311_v1 = vmov 0.0   ;;  %vm48_vm1 = vcmask 31744   ;;  %vm3312_vm2 = vmmov 0   ;;  %s3764_s0 = inlined_call_operand.vmem [shape: f32[2,8,4], index: 0, kind: input, shape index: {}]   ;;  %s3765_s1 = inlined_call_operand.vmem [shape: f32[2,8,4], index: 1, kind: input, shape index: {}]   ;;  %s3766_s2 = inlined_call_operand.vmem [shape: f32[16,32], index: 2, kind: input, shape index: {}]   ;;  %s3767_s3 = inlined_call_operand.vmem [shape: f32[2,65,32], index: 3, kind: input, shape index: {}]   ;;  %s3768_s4 = inlined_call_operand.vmem [shape: f32[35,4], index: 4, kind: input, shape index: {}]   ;;  %s3769_s5 = inlined_call_operand.hbm [shape: f32[2,4,4], index: 5, kind: output, shape index: {}]  }
   0x1   :  { %v3350_v0 = vld [vmem:[%s3766_s2] sm:$0xff]  ;;  %2781 = vmatprep.subr.mxu0 %v3311_v1  ;;  %2801 = vmatprep.subr.mxu1 %v3311_v1  ;;  %v47_v4 = vld [vmem:[%s3764_s0 + $0x8] sm:$0xff] }
   0x2   :  { %v137_v2 = vrot.slane %v3350_v0, 4  ;;  %v46_v3 = vld [vmem:[%s3764_s0] sm:$0xff]  ;;  %2783 = vmatprep.mubr.msk.f32.mxu0 %vm3312_vm2, %v3311_v1  ;;  %2803 = vmatprep.mubr.msk.f32.mxu1 %vm3312_vm2, %v3311_v1  ;;  %v56_v6 = vsel %vm48_vm1, %v47_v4, 0.0 }
   0x3   :  { %v49_v5 = vsel %vm48_vm1, %v46_v3, 0.0  ;;  %v57_v8 = vrot.slane %v56_v6, 4 }
   0x4   :  { %2782 = vmatpush3.msk.msra.mxu0 %vm140_vm0, %v137_v2  ;;  %2802 = vmatpush3.msk.msra.mxu1 %vm140_vm0, %v137_v2  ;;  %v50_v7 = vrot.slane %v49_v5, 4 }
   0x5   :  { %2786 = vmatprep.subr.mxu0 %v3311_v1  ;;  %2806 = vmatprep.subr.mxu1 %v3311_v1 }
   0x6   :  { %10 = vsyncpa [#allocation3], 0  ;;  %v51_v9 = vadd.f32 %v50_v7, %v49_v5  ;;  %v58_v10 = vadd.f32 %v57_v8, %v56_v6  ;;  %v106_v48 = vlaneseq  ;;  %v3391_v56 = vld [vmem:[%s3768_s4 + $0x20] sm:$0x7]  ;;  %v22_v8 = vld [vmem:[%s3766_s2 + $0x8] sm:$0xff]  ;;  %vm735_vm7 = vcmask 261120  }
   0x7   :  { %vm972_vm8 = vcmask 1041409   ;;  %vm126_vm9 = vcmask 1040384   ;;  %vm1571_vm10 = vcmask 1041408   ;;  %vm1574_vm11 = vcmask 1042432  }
   0x8   :  { %v52_v11 = vrot.slane %v51_v9, 2  ;;  %v59_v12 = vrot.slane %v58_v10, 2  ;;  %v3384_v54 = vshrl.u32 %v106_v48, 7  ;;  %vm1579_vm12 = vcmask 1044480  }
   0x9   :  { %vm1582_vm13 = vcmask 1045504   ;;  %vm133_vm14 = vcmask 1046528   ;;  %vm2598_vm15 = vcmask 27648  }
   0xa   :  { %v53_v13 = vadd.f32 %v52_v11, %v51_v9  ;;  %v60_v14 = vadd.f32 %v59_v12, %v58_v10  ;;  %v108_v55 = vsub.s32 1, %v3384_v54  ;;  %v114_v57 = vsub.s32 2, %v3384_v54  ;;  %v23_v11 = vld [vmem:[%s3767_s3] sm:$0xff]  ;;  %v24_v12 = vld [vmem:[%s3767_s3 + $0x8] sm:$0xff] }
   0xb   :  { %v365_v9 = vrot.slane %v22_v8, 4 }
   0xc   :  { %v54_v15 = vrot.slane %v53_v13, 1  ;;  %v61_v16 = vrot.slane %v60_v14, 1  ;;  %v109_v58 = vrot.slane %v3391_v56, %v108_v55  ;;  %v3398_v62 = vrot.slane %v3391_v56, %v114_v57 }
   0xe   :  { %v55_v17 = vadd.f32 %v54_v15, %v53_v13  ;;  %v62_v18 = vadd.f32 %v61_v16, %v60_v14  ;;  %v3313_v13 = vmov 0.0|0.0   ;;  %v118_v14 = vld [vmem:[%s3765_s1] sm:$0xff]  ;;  %v3064_v15 = vpack.c.bf16 %v24_v12, %v23_v11  ;;  %v119_v16 = vld [vmem:[%s3765_s1 + $0x8] sm:$0xff] }
  0x10   :  { %v3371_v19 = vmul.f32 0.125, %v55_v17  ;;  %v3373_v20 = vmul.f32 0.125, %v62_v18  ;;  %v25_v17 = vld [vmem:[%s3767_s3 + $0x10] sm:$0xff]  ;;  %v26_v18 = vld [vmem:[%s3767_s3 + $0x18] sm:$0xff] }
  0x12   :  { %v66_v21 = vsub.f32 %v46_v3, %v3371_v19  ;;  %v67_v22 = vsub.f32 %v47_v4, %v3373_v20 }
  0x14   :  { %v68_v23 = vmul.f32 %v66_v21, %v66_v21  ;;  %v69_v24 = vmul.f32 %v67_v22, %v67_v22 }
  0x16   :  { %v70_v25 = vsel %vm48_vm1, %v68_v23, 0.0  ;;  %v77_v26 = vsel %vm48_vm1, %v69_v24, 0.0  ;;  %v28_v23 = vld [vmem:[%s3767_s3 + $0x28] sm:$0xff] }
  0x17   :  { %v71_v27 = vrot.slane %v70_v25, 4  ;;  %v78_v28 = vrot.slane %v77_v26, 4 }
  0x19   :  { %v72_v29 = vadd.f32 %v71_v27, %v70_v25  ;;  %v79_v30 = vadd.f32 %v78_v28, %v77_v26  ;;  %v29_v25 = vld [vmem:[%s3767_s3 + $0x30] sm:$0xff]  ;;  %v30_v26 = vld [vmem:[%s3767_s3 + $0x38] sm:$0xff] }
  0x1b   :  { %v73_v31 = vrot.slane %v72_v29, 2  ;;  %v80_v32 = vrot.slane %v79_v30, 2 }
  0x1d   :  { %v74_v33 = vadd.f32 %v73_v31, %v72_v29  ;;  %v81_v34 = vadd.f32 %v80_v32, %v79_v30  ;;  %v3482_v31 = vpack.c.bf16 %v30_v26, %v29_v25 }
  0x1f   :  { %v75_v35 = vrot.slane %v74_v33, 1  ;;  %v82_v36 = vrot.slane %v81_v34, 1 }
  0x21   :  { %v76_v37 = vadd.f32 %v75_v35, %v74_v33  ;;  %v83_v38 = vadd.f32 %v82_v36, %v81_v34  ;;  %v2635_v36 = vld [vmem:[%s3767_s3 + $0x40] ss:$0 sm:$0xff] }
  0x23   :  { %v84_v39 = vmul.f32 0.125, %v76_v37  ;;  %v85_v40 = vmul.f32 0.125, %v83_v38 }
  0x25   :  { %v86_v41 = vadd.f32 1e-05, %v84_v39  ;;  %v87_v42 = vadd.f32 1e-05, %v85_v40 }
  0x27   :  { %3213 = vrsqrt.f32 %v86_v41  ;;  %vm90_vm3 = vcmp.eq.f32.partialorder %v86_v41, inf  ;;  %v93_v44 = vand.u32 2147483648, %v86_v41  ;;  %vm92_vm4 = vcmp.eq.f32.partialorder %v86_v41, 0.0 }
  0x28   :  { %3215 = vrsqrt.f32 %v87_v42  ;;  %vm97_vm5 = vcmp.eq.f32.partialorder %v87_v42, inf  ;;  %v100_v47 = vand.u32 2147483648, %v87_v42  ;;  %vm99_vm6 = vcmp.eq.f32.partialorder %v87_v42, 0.0 }
  0x31   :  { %v3214_v43 = vpop.eup %3213 }
  0x32   :  { %v3216_v45 = vpop.eup %3215  ;;  %v89_v46 = vmul.f32 %v3214_v43, %v86_v41 }
  0x33   :  { %v96_v49 = vmul.f32 %v3216_v45, %v87_v42 }
  0x34   :  { %v91_v50 = vsel %vm90_vm3, %v86_v41, %v89_v46 }
  0x35   :  { %v3379_v51 = vsel %vm92_vm4, %v93_v44, %v91_v50  ;;  %v98_v52 = vsel %vm97_vm5, %v87_v42, %v96_v49 }
  0x36   :  { %3217 = vrcp.f32 %v3379_v51  ;;  %v3382_v53 = vsel %vm99_vm6, %v100_v47, %v98_v52 }
  0x37   :  { %3219 = vrcp.f32 %v3382_v53 }
  0x40   :  { %v3218_v59 = vpop.eup %3217 }
  0x41   :  { %v3220_v60 = vpop.eup %3219  ;;  %v104_v61 = vmul.f32 %v3218_v59, %v66_v21  ;;  %v3067_v21 = vpack.c.bf16 %v26_v18, %v25_v17 }
  0x42   :  { %v105_v63 = vmul.f32 %v3220_v60, %v67_v22  ;;  %v27_v22 = vld [vmem:[%s3767_s3 + $0x20] sm:$0xff] }
  0x43   :  { %v110_v2 = vmul.f32 %v109_v58, %v104_v61  ;;  %v3471_v24 = vpack.c.bf16 %v28_v23, %v27_v22 }
  0x44   :  { %v111_v3 = vmul.f32 %v109_v58, %v105_v63 }
  0x45   :  { %v116_v4 = vadd.f32 %v3398_v62, %v110_v2 }
  0x46   :  { %v117_v5 = vadd.f32 %v3398_v62, %v111_v3 }
  0x47   :  { %2784 = vmatmul.mubr.msk.f32.vlgmr.msra.gmra.mrb[0].mxu0 %vm48_vm1, %v116_v4  ;;  %v122_v6 = vrot.slane %v116_v4, 7 }
  0x48   :  { %2787 = vmatpush3.msk.msra.mxu0 %vm140_vm0, %v3350_v0  ;;  %2804 = vmatmul.mubr.msk.f32.vlgmr.msra.gmra.mrb[0].mxu1 %vm48_vm1, %v117_v5  ;;  %v123_v7 = vrot.slane %v117_v5, 7  ;;  %v130_v10 = vrot.slane %v117_v5, 1 }
  0x49   :  { %2788 = vmatprep.mubr.msk.f32.mxu0 %vm3312_vm2, %v3311_v1  ;;  %2791 = vmatprep.subr.mxu0 %v3311_v1 }
  0x4a   :  { %2807 = vmatpush3.msk.msra.mxu1 %vm140_vm0, %v3350_v0  ;;  %2808 = vmatprep.mubr.msk.f32.mxu1 %vm3312_vm2, %v3311_v1  ;;  %v129_v0 = vrot.slane %v116_v4, 1 }
  0x4b   :  { %2811 = vmatprep.subr.mxu1 %v3311_v1 }
  0x4f   :  { %2789 = vmatmul.mubr.msk.f32.vlgmr.msra.gmra.mrb[0].mxu0 %vm48_vm1, %v122_v6 }
  0x50   :  { %2792 = vmatpush3.msk.msra.mxu0 %vm140_vm0, %v22_v8  ;;  %2809 = vmatmul.mubr.msk.f32.vlgmr.msra.gmra.mrb[0].mxu1 %vm48_vm1, %v123_v7 }
  0x51   :  { %2793 = vmatprep.mubr.msk.f32.mxu0 %vm3312_vm2, %v3311_v1  ;;  %2796 = vmatprep.subr.mxu0 %v3311_v1 }
  0x52   :  { %2812 = vmatpush3.msk.msra.mxu1 %vm140_vm0, %v22_v8  ;;  %2813 = vmatprep.mubr.msk.f32.mxu1 %vm3312_vm2, %v3311_v1 }
  0x53   :  { %2816 = vmatprep.subr.mxu1 %v3311_v1 }
  0x57   :  { %2794 = vmatmul.mubr.msk.f32.vlgmr.msra.gmra.mrb[0].mxu0 %vm48_vm1, %v129_v0 }
  0x58   :  { %2797 = vmatpush3.msk.msra.mxu0 %vm140_vm0, %v365_v9  ;;  %2814 = vmatmul.mubr.msk.f32.vlgmr.msra.gmra.mrb[0].mxu1 %vm48_vm1, %v130_v10 }
  0x59   :  { %2798 = vmatprep.mubr.msk.f32.mxu0 %vm3312_vm2, %v3311_v1  ;;  %2817 = vmatpush3.msk.msra.mxu1 %vm140_vm0, %v365_v9 }
  0x5a   :  { %2818 = vmatprep.mubr.msk.f32.mxu1 %vm3312_vm2, %v3311_v1  ;;  %3063 = vmatprep.subr.bf16.mxu0 %v3313_v13 }
  0x5b   :  { %3069 = vmatprep.subr.bf16.mxu1 %v3313_v13 }
  0x5f   :  { %2799 = vmatmul.mubr.msk.f32.vlgmr.msra.gmra.mrb[0].mxu0 %vm48_vm1, %v118_v14 }
  0x60   :  { %2819 = vmatmul.mubr.msk.f32.vlgmr.msra.gmra.mrb[0].mxu1 %vm48_vm1, %v119_v16  ;;  %3065 = vmatpush3.bf16.msra.mxu0 %v3064_v15 }
  0x61   :  { %3071 = vmatpush3.bf16.msra.mxu1 %v3064_v15  ;;  %3066 = vmatprep.subr.bf16.mxu0 %v3313_v13 }
  0x62   :  { %3072 = vmatprep.subr.bf16.mxu1 %v3313_v13  ;;  %2829 = vmatprep.mubr.msk.f32.mxu0 %vm3312_vm2, %v3311_v1 }
  0x63   :  { %2840 = vmatprep.mubr.msk.f32.mxu1 %vm3312_vm2, %v3311_v1 }
  0x64   :  { %3068 = vmatpush3.bf16.msra.mxu0 %v3067_v21 }
  0x65   :  { %3074 = vmatpush3.bf16.msra.mxu1 %v3067_v21  ;;  %3075 = vmatprep.subr.bf16.mxu0 %v3313_v13 }
  0x66   :  { %3081 = vmatprep.subr.bf16.mxu1 %v3313_v13 }
 0x132   :  { %v437_v27 = vpop.f32.mrb[0].mxu0 }
 0x133   :  { %v730_v28 = vpop.f32.mrb[0].mxu1  ;;  %v2800_v29 = vpop.f32.mrb[1].mxu0  ;;  %2830 = vmatmul.mubr.msk.f32.vlgmr.msra.gmra.mrb[2].mxu0 %vm735_vm7, %v437_v27 }
 0x134   :  { %v2820_v30 = vpop.f32.mrb[1].mxu1  ;;  %2841 = vmatmul.mubr.msk.f32.vlgmr.msra.gmra.mrb[2].mxu1 %vm735_vm7, %v730_v28  ;;  %3077 = vmatpush3.bf16.msra.mxu0 %v3471_v24 }
 0x135   :  { %3078 = vmatprep.subr.bf16.mxu0 %v3313_v13  ;;  %2851 = vmatprep.mubr.msk.f32.mxu0 %vm3312_vm2, %v3311_v1 }
 0x136   :  { %3083 = vmatpush3.bf16.msra.mxu1 %v3471_v24  ;;  %2862 = vmatprep.mubr.msk.f32.mxu1 %vm3312_vm2, %v3311_v1 }
 0x137   :  { %3084 = vmatprep.subr.bf16.mxu1 %v3313_v13 }
 0x138   :  { %3080 = vmatpush3.bf16.msra.mxu0 %v3482_v31 }
 0x139   :  { %3087 = vmatprep.subr.bf16.mxu0 %v3313_v13 }
 0x13a   :  { %3086 = vmatpush3.bf16.msra.mxu1 %v3482_v31 }
 0x13b   :  { %2852 = vmatmul.mubr.f32.vlgmr.msra.gmra.mrb[4].mxu0 %v3311_v1  ;;  %3093 = vmatprep.subr.bf16.mxu1 %v3313_v13 }
 0x13c   :  { %3089 = vmatpush3.bf16.msra.mxu0 %v3471_v24  ;;  %2873 = vmatprep.mubr.msk.f32.mxu0 %vm3312_vm2, %v3311_v1 }
 0x13d   :  { %3090 = vmatprep.subr.bf16.mxu0 %v3313_v13 }
 0x140   :  { %3092 = vmatpush3.bf16.msra.mxu0 %v3482_v31 }
 0x141   :  { %3099 = vmatprep.subr.bf16.mxu0 %v3313_v13 }
 0x206   :  { %v805_v32 = vpop.f32.mrb[2].mxu0 }
 0x207   :  { %v878_v33 = vpop.f32.mrb[2].mxu1  ;;  %v2831_v34 = vpop.f32.mrb[3].mxu0  ;;  %v3505_v38 = vadd.f32 %v2635_v36, %v805_v32 }
 0x208   :  { %v2842_v35 = vpop.f32.mrb[3].mxu1  ;;  %v3507_v39 = vadd.f32 %v2635_v36, %v878_v33 }
 0x20e   :  { %v957_v37 = vpop.f32.mrb[4].mxu0 }
 0x20f   :  { %v962_v40 = vrot.slane %v957_v37, 1  ;;  %v2853_v41 = vpop.f32.mrb[5].mxu0  ;;  %v965_v42 = vadd.f32 %v957_v37, %v3505_v38 }
 0x211   :  { %v966_v43 = vadd.f32 %v962_v40, %v3507_v39 }
 0x213   :  { %3221 = vtanh.f32 %v966_v43 }
 0x214   :  { %3223 = vtanh.f32 %v965_v42 }
 0x21d   :  { %v3222_v44 = vpop.eup %3221 }
 0x21e   :  { %v971_v45 = vrot.slane %v3222_v44, 7  ;;  %v3224_v46 = vpop.eup %3223 }
 0x220   :  { %v973_v47 = vsel %vm972_vm8, %v971_v45, %v3224_v46 }
 0x221   :  { %2863 = vmatmul.mubr.msk.f32.vlgmr.msra.gmra.mrb[4].mxu1 %vm735_vm7, %v973_v47 }
 0x222   :  { %3095 = vmatpush3.bf16.msra.mxu1 %v3471_v24  ;;  %2884 = vmatprep.mubr.msk.f32.mxu1 %vm3312_vm2, %v3311_v1 }
 0x223   :  { %3096 = vmatprep.subr.bf16.mxu1 %v3313_v13 }
 0x226   :  { %3098 = vmatpush3.bf16.msra.mxu1 %v3482_v31 }
 0x227   :  { %3105 = vmatprep.subr.bf16.mxu1 %v3313_v13 }
 0x2f4   :  { %v1042_v48 = vpop.f32.mrb[4].mxu1 }
 0x2f5   :  { %v1047_v49 = vrot.slane %v1042_v48, 7  ;;  %v2864_v50 = vpop.f32.mrb[5].mxu1  ;;  %v1051_v57 = vadd.f32 %v1042_v48, %v3507_v39 }
 0x2f7   :  { %v1050_v52 = vadd.f32 %v1047_v49, %v3505_v38 }
 0x2f9   :  { %3225 = vtanh.f32 %v1050_v52 }
 0x2fa   :  { %3227 = vtanh.f32 %v1051_v57 }
 0x303   :  { %v3226_v58 = vpop.eup %3225 }
 0x304   :  { %v1056_v59 = vrot.slane %v3226_v58, 1  ;;  %v3228_v60 = vpop.eup %3227  ;;  %v1569_v8 = vsel %vm126_vm9, %v3224_v46, %v3226_v58 }
 0x305   :  { %v1570_v11 = vsel %vm126_vm9, %v3222_v44, %v3228_v60 }
 0x306   :  { %v1057_v61 = vsel %vm972_vm8, %v3228_v60, %v1056_v59 }
 0x307   :  { %2874 = vmatmul.mubr.msk.f32.vlgmr.msra.gmra.mrb[6].mxu0 %vm735_vm7, %v1057_v61 }
 0x308   :  { %3101 = vmatpush3.bf16.msra.mxu0 %v3471_v24  ;;  %2895 = vmatprep.mubr.msk.f32.mxu0 %vm3312_vm2, %v3311_v1 }
 0x309   :  { %3102 = vmatprep.subr.bf16.mxu0 %v3313_v13 }
 0x30c   :  { %3104 = vmatpush3.bf16.msra.mxu0 %v3482_v31 }
 0x30d   :  { %3111 = vmatprep.subr.bf16.mxu0 %v3313_v13 }
 0x3da   :  { %v1126_v63 = vpop.f32.mrb[6].mxu0 }
 0x3db   :  { %v1131_v2 = vrot.slane %v1126_v63, 6  ;;  %v1132_v3 = vrot.slane %v1126_v63, 7  ;;  %v2875_v4 = vpop.f32.mrb[7].mxu0 }
 0x3dd   :  { %v1135_v5 = vadd.f32 %v1131_v2, %v3505_v38  ;;  %v1136_v6 = vadd.f32 %v1132_v3, %v3507_v39 }
 0x3df   :  { %3229 = vtanh.f32 %v1135_v5 }
 0x3e0   :  { %3231 = vtanh.f32 %v1136_v6 }
 0x3e9   :  { %v3230_v7 = vpop.eup %3229 }
 0x3ea   :  { %v3232_v0 = vpop.eup %3231  ;;  %v1141_v9 = vrot.slane %v3230_v7, 2  ;;  %v1572_v10 = vsel %vm1571_vm10, %v1569_v8, %v3230_v7 }
 0x3eb   :  { %v1142_v12 = vrot.slane %v3232_v0, 1  ;;  %v1573_v14 = vsel %vm1571_vm10, %v1570_v11, %v3232_v0 }
 0x3ed   :  { %v1143_v15 = vsel %vm972_vm8, %v1142_v12, %v1141_v9 }
 0x3ee   :  { %2885 = vmatmul.mubr.msk.f32.vlgmr.msra.gmra.mrb[6].mxu1 %vm735_vm7, %v1143_v15 }
 0x3ef   :  { %3107 = vmatpush3.bf16.msra.mxu1 %v3471_v24  ;;  %2906 = vmatprep.mubr.msk.f32.mxu1 %vm3312_vm2, %v3311_v1 }
 0x3f0   :  { %3108 = vmatprep.subr.bf16.mxu1 %v3313_v13 }
 0x3f3   :  { %3110 = vmatpush3.bf16.msra.mxu1 %v3482_v31 }
 0x3f4   :  { %3117 = vmatprep.subr.bf16.mxu1 %v3313_v13 }
 0x4c1   :  { %v1212_v16 = vpop.f32.mrb[6].mxu1 }
 0x4c2   :  { %v1217_v17 = vrot.slane %v1212_v16, 5  ;;  %v1218_v18 = vrot.slane %v1212_v16, 6  ;;  %v2886_v21 = vpop.f32.mrb[7].mxu1  ;;  %v32_v16 = vld [vmem:[%s3767_s3 + $0x48] sm:$0xff] }
 0x4c4   :  { %v1221_v22 = vadd.f32 %v1217_v17, %v3505_v38  ;;  %v1222_v23 = vadd.f32 %v1218_v18, %v3507_v39  ;;  %v33_v17 = vld [vmem:[%s3767_s3 + $0x50] sm:$0xff]  ;;  %v34_v18 = vld [vmem:[%s3767_s3 + $0x58] sm:$0xff] }
 0x4c5   :  { %v3124_v21 = vpack.c.bf16 %v33_v17, %v32_v16 }
 0x4c6   :  { %3233 = vtanh.f32 %v1221_v22  ;;  %v35_v22 = vld [vmem:[%s3767_s3 + $0x60] sm:$0xff] }
 0x4c7   :  { %3235 = vtanh.f32 %v1222_v23  ;;  %v3127_v23 = vpack.c.bf16 %v35_v22, %v34_v18 }
 0x4d0   :  { %v3234_v25 = vpop.eup %3233 }
 0x4d1   :  { %v3236_v26 = vpop.eup %3235  ;;  %v1227_v27 = vrot.slane %v3234_v25, 3  ;;  %v1575_v28 = vsel %vm1574_vm11, %v1572_v10, %v3234_v25 }
 0x4d2   :  { %v1228_v29 = vrot.slane %v3236_v26, 2  ;;  %v1576_v30 = vsel %vm1574_vm11, %v1573_v14, %v3236_v26 }
 0x4d4   :  { %v1229_v32 = vsel %vm972_vm8, %v1228_v29, %v1227_v27 }
 0x4d5   :  { %2896 = vmatmul.mubr.msk.f32.vlgmr.msra.gmra.mrb[8].mxu0 %vm735_vm7, %v1229_v32  ;;  %v36_v32 = vld [vmem:[%s3767_s3 + $0x68] sm:$0xff] }
 0x4d6   :  { %3113 = vmatpush3.bf16.msra.mxu0 %v3471_v24  ;;  %2917 = vmatprep.mubr.msk.f32.mxu0 %vm3312_vm2, %v3311_v1 }
 0x4d7   :  { %3114 = vmatprep.subr.bf16.mxu0 %v3313_v13 }
 0x4da   :  { %3116 = vmatpush3.bf16.msra.mxu0 %v3482_v31 }
 0x4db   :  { %3123 = vmatprep.subr.bf16.mxu0 %v3313_v13 }
 0x5a8   :  { %v1298_v33 = vpop.f32.mrb[8].mxu0 }
 0x5a9   :  { %v1303_v34 = vrot.slane %v1298_v33, 4  ;;  %v1304_v35 = vrot.slane %v1298_v33, 5  ;;  %v2897_v36 = vpop.f32.mrb[9].mxu0  ;;  %v37_v33 = vld [vmem:[%s3767_s3 + $0x70] sm:$0xff] }
 0x5ab   :  { %v1307_v37 = vadd.f32 %v1303_v34, %v3505_v38  ;;  %v1308_v40 = vadd.f32 %v1304_v35, %v3507_v39  ;;  %v3607_v34 = vpack.c.bf16 %v37_v33, %v36_v32 }
 0x5ad   :  { %3237 = vtanh.f32 %v1307_v37 }
 0x5ae   :  { %3239 = vtanh.f32 %v1308_v40 }
 0x5b7   :  { %v3238_v41 = vpop.eup %3237 }
 0x5b8   :  { %v3240_v42 = vpop.eup %3239  ;;  %v1313_v43 = vrot.slane %v3238_v41, 4  ;;  %v1577_v44 = vsel %vm140_vm0, %v1575_v28, %v3238_v41 }
 0x5b9   :  { %v1314_v45 = vrot.slane %v3240_v42, 3  ;;  %v1578_v46 = vsel %vm140_vm0, %v1576_v30, %v3240_v42 }
 0x5bb   :  { %v1315_v47 = vsel %vm972_vm8, %v1314_v45, %v1313_v43 }
 0x5bc   :  { %2907 = vmatmul.mubr.msk.f32.vlgmr.msra.gmra.mrb[8].mxu1 %vm735_vm7, %v1315_v47 }
 0x5bd   :  { %3119 = vmatpush3.bf16.msra.mxu1 %v3471_v24  ;;  %2928 = vmatprep.mubr.msk.f32.mxu1 %vm3312_vm2, %v3311_v1 }
 0x5be   :  { %3120 = vmatprep.subr.bf16.mxu1 %v3313_v13 }
 0x5c1   :  { %3122 = vmatpush3.bf16.msra.mxu1 %v3482_v31 }
 0x5c2   :  { %3129 = vmatprep.subr.bf16.mxu1 %v3313_v13 }
 0x68f   :  { %v1384_v48 = vpop.f32.mrb[8].mxu1 }
 0x690   :  { %v1389_v49 = vrot.slane %v1384_v48, 3  ;;  %v1390_v50 = vrot.slane %v1384_v48, 4  ;;  %v2908_v52 = vpop.f32.mrb[9].mxu1 }
 0x692   :  { %v1393_v57 = vadd.f32 %v1389_v49, %v3505_v38  ;;  %v1394_v58 = vadd.f32 %v1390_v50, %v3507_v39 }
 0x694   :  { %3241 = vtanh.f32 %v1393_v57 }
 0x695   :  { %3243 = vtanh.f32 %v1394_v58 }
 0x69e   :  { %v3242_v24 = vpop.eup %3241 }
 0x69f   :  { %v3244_v59 = vpop.eup %3243  ;;  %v1399_v60 = vrot.slane %v3242_v24, 5  ;;  %v1580_v61 = vsel %vm1579_vm12, %v1577_v44, %v3242_v24 }
 0x6a0   :  { %v1400_v63 = vrot.slane %v3244_v59, 4  ;;  %v1581_v31 = vsel %vm1579_vm12, %v1578_v46, %v3244_v59  ;;  %v2645_v46 = vld [vmem:[%s3767_s3 + $0x88] ss:$0 sm:$0xff] }
 0x6a2   :  { %v1401_v2 = vsel %vm972_vm8, %v1400_v63, %v1399_v60 }
 0x6a3   :  { %2918 = vmatmul.mubr.msk.f32.vlgmr.msra.gmra.mrb[10].mxu0 %vm735_vm7, %v1401_v2 }
 0x6a4   :  { %2939 = vmatprep.mubr.msk.f32.mxu0 %vm3312_vm2, %v3311_v1  ;;  %3125 = vmatpush3.bf16.msra.mxu0 %v3124_v21 }
 0x6a5   :  { %3126 = vmatprep.subr.bf16.mxu0 %v3313_v13 }
 0x6a8   :  { %3128 = vmatpush3.bf16.msra.mxu0 %v3127_v23 }
 0x6a9   :  { %3135 = vmatprep.subr.bf16.mxu0 %v3313_v13 }
 0x776   :  { %v1470_v3 = vpop.f32.mrb[10].mxu0 }
 0x777   :  { %v1475_v4 = vrot.slane %v1470_v3, 2  ;;  %v1476_v5 = vrot.slane %v1470_v3, 3  ;;  %v2919_v6 = vpop.f32.mrb[11].mxu0 }
 0x779   :  { %v1479_v7 = vadd.f32 %v1475_v4, %v3505_v38  ;;  %v1480_v8 = vadd.f32 %v1476_v5, %v3507_v39 }
 0x77b   :  { %3245 = vtanh.f32 %v1479_v7 }
 0x77c   :  { %3247 = vtanh.f32 %v1480_v8 }
 0x785   :  { %v3246_v0 = vpop.eup %3245 }
 0x786   :  { %v3248_v9 = vpop.eup %3247  ;;  %v1485_v10 = vrot.slane %v3246_v0, 6  ;;  %v1583_v11 = vsel %vm1582_vm13, %v1580_v61, %v3246_v0 }
 0x787   :  { %v1486_v12 = vrot.slane %v3248_v9, 5  ;;  %v1584_v14 = vsel %vm1582_vm13, %v1581_v31, %v3248_v9 }
 0x789   :  { %v1487_v15 = vsel %vm972_vm8, %v1486_v12, %v1485_v10 }
 0x78a   :  { %2929 = vmatmul.mubr.msk.f32.vlgmr.msra.gmra.mrb[10].mxu1 %vm735_vm7, %v1487_v15 }
 0x78b   :  { %2950 = vmatprep.mubr.msk.f32.mxu1 %vm3312_vm2, %v3311_v1  ;;  %3131 = vmatpush3.bf16.msra.mxu1 %v3124_v21 }
 0x78c   :  { %3132 = vmatprep.subr.bf16.mxu1 %v3313_v13 }
 0x78f   :  { %3134 = vmatpush3.bf16.msra.mxu1 %v3127_v23 }
 0x790   :  { %3141 = vmatprep.subr.bf16.mxu1 %v3313_v13 }
 0x85d   :  { %v1556_v25 = vpop.f32.mrb[10].mxu1 }
 0x85e   :  { %v1561_v26 = vrot.slane %v1556_v25, 1  ;;  %v1562_v27 = vrot.slane %v1556_v25, 2  ;;  %v2930_v28 = vpop.f32.mrb[11].mxu1 }
 0x860   :  { %v1565_v29 = vadd.f32 %v1561_v26, %v3505_v38  ;;  %v1566_v30 = vadd.f32 %v1562_v27, %v3507_v39  ;;  %v38_v38 = vld [vmem:[%s3767_s3 + $0x78] sm:$0xff]  ;;  %v39_v39 = vld [vmem:[%s3767_s3 + $0x80] sm:$0xff] }
 0x861   :  { %v3620_v41 = vpack.c.bf16 %v39_v39, %v38_v38 }
 0x862   :  { %3249 = vtanh.f32 %v1565_v29 }
 0x863   :  { %3251 = vtanh.f32 %v1566_v30 }
 0x86c   :  { %v3250_v35 = vpop.eup %3249 }
 0x86d   :  { %v3252_v36 = vpop.eup %3251  ;;  %v1585_v37 = vsel %vm133_vm14, %v1583_v11, %v3250_v35 }
 0x86e   :  { %2940 = vmatmul.mubr.msk.f32.vlgmr.msra.gmra.mrb[12].mxu0 %vm735_vm7, %v1585_v37  ;;  %v1586_v40 = vsel %vm133_vm14, %v1584_v14, %v3252_v36 }
 0x86f   :  { %2951 = vmatmul.mubr.msk.f32.vlgmr.msra.gmra.mrb[12].mxu1 %vm735_vm7, %v1586_v40  ;;  %3137 = vmatpush3.bf16.msra.mxu0 %v3607_v34 }
 0x870   :  { %3138 = vmatprep.subr.bf16.mxu0 %v3313_v13  ;;  %2961 = vmatprep.mubr.msk.f32.mxu0 %vm3312_vm2, %v3311_v1 }
 0x871   :  { %3143 = vmatpush3.bf16.msra.mxu1 %v3607_v34  ;;  %2972 = vmatprep.mubr.msk.f32.mxu1 %vm3312_vm2, %v3311_v1 }
 0x872   :  { %3144 = vmatprep.subr.bf16.mxu1 %v3313_v13 }
 0x873   :  { %3140 = vmatpush3.bf16.msra.mxu0 %v3620_v41 }
 0x874   :  { %3147 = vmatprep.subr.bf16.mxu0 %v3313_v13 }
 0x875   :  { %3146 = vmatpush3.bf16.msra.mxu1 %v3620_v41 }
 0x876   :  { %2962 = vmatmul.mubr.f32.vlgmr.msra.gmra.mrb[14].mxu0 %v3311_v1  ;;  %3153 = vmatprep.subr.bf16.mxu1 %v3313_v13 }
 0x877   :  { %3149 = vmatpush3.bf16.msra.mxu0 %v3607_v34  ;;  %2983 = vmatprep.mubr.msk.f32.mxu0 %vm3312_vm2, %v3311_v1 }
 0x878   :  { %3150 = vmatprep.subr.bf16.mxu0 %v3313_v13 }
 0x87b   :  { %3152 = vmatpush3.bf16.msra.mxu0 %v3620_v41 }
 0x87c   :  { %3159 = vmatprep.subr.bf16.mxu0 %v3313_v13 }
 0x941   :  { %v1656_v42 = vpop.f32.mrb[12].mxu0 }
 0x942   :  { %v1729_v43 = vpop.f32.mrb[12].mxu1  ;;  %v2941_v44 = vpop.f32.mrb[13].mxu0  ;;  %v3643_v48 = vadd.f32 %v2645_v46, %v1656_v42 }
 0x943   :  { %v2952_v45 = vpop.f32.mrb[13].mxu1  ;;  %v3645_v49 = vadd.f32 %v2645_v46, %v1729_v43 }
 0x949   :  { %v1805_v47 = vpop.f32.mrb[14].mxu0 }
 0x94a   :  { %v1810_v50 = vrot.slane %v1805_v47, 1  ;;  %v2963_v52 = vpop.f32.mrb[15].mxu0  ;;  %v1813_v57 = vadd.f32 %v1805_v47, %v3643_v48 }
 0x94c   :  { %v1814_v58 = vadd.f32 %v1810_v50, %v3645_v49 }
 0x94e   :  { %3253 = vtanh.f32 %v1814_v58 }
 0x94f   :  { %3255 = vtanh.f32 %v1813_v57 }
 0x958   :  { %v3254_v24 = vpop.eup %3253 }
 0x959   :  { %v1819_v59 = vrot.slane %v3254_v24, 7  ;;  %v3256_v60 = vpop.eup %3255 }
 0x95b   :  { %v1820_v61 = vsel %vm972_vm8, %v1819_v59, %v3256_v60 }
 0x95c   :  { %2973 = vmatmul.mubr.msk.f32.vlgmr.msra.gmra.mrb[14].mxu1 %vm735_vm7, %v1820_v61 }
 0x95d   :  { %3155 = vmatpush3.bf16.msra.mxu1 %v3607_v34  ;;  %2994 = vmatprep.mubr.msk.f32.mxu1 %vm3312_vm2, %v3311_v1 }
 0x95e   :  { %3156 = vmatprep.subr.bf16.mxu1 %v3313_v13 }
 0x961   :  { %3158 = vmatpush3.bf16.msra.mxu1 %v3620_v41 }
 0x962   :  { %3165 = vmatprep.subr.bf16.mxu1 %v3313_v13 }
 0xa2f   :  { %v1889_v63 = vpop.f32.mrb[14].mxu1 }
 0xa30   :  { %v1894_v31 = vrot.slane %v1889_v63, 7  ;;  %v2974_v2 = vpop.f32.mrb[15].mxu1  ;;  %v1898_v4 = vadd.f32 %v1889_v63, %v3645_v49 }
 0xa32   :  { %v1897_v3 = vadd.f32 %v1894_v31, %v3643_v48 }
 0xa34   :  { %3257 = vtanh.f32 %v1897_v3 }
 0xa35   :  { %3259 = vtanh.f32 %v1898_v4 }
 0xa3e   :  { %v3258_v5 = vpop.eup %3257 }
 0xa3f   :  { %v1903_v6 = vrot.slane %v3258_v5, 1  ;;  %v3260_v7 = vpop.eup %3259  ;;  %v2416_v16 = vsel %vm126_vm9, %v3256_v60, %v3258_v5 }
 0xa40   :  { %v2417_v22 = vsel %vm126_vm9, %v3254_v24, %v3260_v7 }
 0xa41   :  { %v1904_v8 = vsel %vm972_vm8, %v3260_v7, %v1903_v6 }
 0xa42   :  { %2984 = vmatmul.mubr.msk.f32.vlgmr.msra.gmra.mrb[16].mxu0 %vm735_vm7, %v1904_v8 }
 0xa43   :  { %3161 = vmatpush3.bf16.msra.mxu0 %v3607_v34  ;;  %3005 = vmatprep.mubr.msk.f32.mxu0 %vm3312_vm2, %v3311_v1 }
 0xa44   :  { %3162 = vmatprep.subr.bf16.mxu0 %v3313_v13 }
 0xa47   :  { %3164 = vmatpush3.bf16.msra.mxu0 %v3620_v41 }
 0xa48   :  { %3171 = vmatprep.subr.bf16.mxu0 %v3313_v13 }
 0xb15   :  { %v1973_v0 = vpop.f32.mrb[16].mxu0 }
 0xb16   :  { %v1978_v9 = vrot.slane %v1973_v0, 6  ;;  %v1979_v10 = vrot.slane %v1973_v0, 7  ;;  %v2985_v11 = vpop.f32.mrb[17].mxu0 }
 0xb18   :  { %v1982_v12 = vadd.f32 %v1978_v9, %v3643_v48  ;;  %v1983_v14 = vadd.f32 %v1979_v10, %v3645_v49 }
 0xb1a   :  { %3261 = vtanh.f32 %v1982_v12 }
 0xb1b   :  { %3263 = vtanh.f32 %v1983_v14 }
 0xb24   :  { %v3262_v15 = vpop.eup %3261 }
 0xb25   :  { %v3264_v17 = vpop.eup %3263  ;;  %v1988_v18 = vrot.slane %v3262_v15, 2  ;;  %v2418_v21 = vsel %vm1571_vm10, %v2416_v16, %v3262_v15 }
 0xb26   :  { %v1989_v23 = vrot.slane %v3264_v17, 1  ;;  %v2419_v25 = vsel %vm1571_vm10, %v2417_v22, %v3264_v17 }
 0xb28   :  { %v1990_v26 = vsel %vm972_vm8, %v1989_v23, %v1988_v18 }
 0xb29   :  { %2995 = vmatmul.mubr.msk.f32.vlgmr.msra.gmra.mrb[16].mxu1 %vm735_vm7, %v1990_v26 }
 0xb2a   :  { %3167 = vmatpush3.bf16.msra.mxu1 %v3607_v34  ;;  %3016 = vmatprep.mubr.msk.f32.mxu1 %vm3312_vm2, %v3311_v1 }
 0xb2b   :  { %3168 = vmatprep.subr.bf16.mxu1 %v3313_v13 }
 0xb2e   :  { %3170 = vmatpush3.bf16.msra.mxu1 %v3620_v41 }
 0xb2f   :  { %3177 = vmatprep.subr.bf16.mxu1 %v3313_v13 }
 0xbfc   :  { %v2059_v27 = vpop.f32.mrb[16].mxu1 }
 0xbfd   :  { %v2064_v28 = vrot.slane %v2059_v27, 5  ;;  %v2065_v29 = vrot.slane %v2059_v27, 6  ;;  %v2996_v30 = vpop.f32.mrb[17].mxu1  ;;  %v41_v27 = vld [vmem:[%s3768_s4] sm:$0xff] }
 0xbff   :  { %v2068_v32 = vadd.f32 %v2064_v28, %v3643_v48  ;;  %v2069_v33 = vadd.f32 %v2065_v29, %v3645_v49  ;;  %v42_v28 = vld [vmem:[%s3768_s4 + $0x8] sm:$0xff]  ;;  %v43_v29 = vld [vmem:[%s3768_s4 + $0x10] sm:$0xff] }
 0xc00   :  { %v3184_v30 = vpack.c.bf16 %v42_v28, %v41_v27 }
 0xc01   :  { %3265 = vtanh.f32 %v2068_v32  ;;  %v44_v32 = vld [vmem:[%s3768_s4 + $0x18] sm:$0xff]  ;;  %s3314_s4 = smov [#allocation2]  }
 0xc02   :  { %3267 = vtanh.f32 %v2069_v33  ;;  %s2606_s19 = sshll.u32 %s3314_s4, 4  ;;  %s2607_s19 = int_to_ptr.vmem [resolvable:$true] %s2606_s19 }
 0xc03   :  { %s3287_s20 = scalar_lea.vmem %s2607_s19, 128  ;;  %p3292_p1 = scmp.lt.s32.totalorder %s2607_s19, %s2607_s19 }
 0xc04   :  { %p3288_p0 = scmp.ne.s32.totalorder %s2607_s19, %s3287_s20  ;;  %p3293_p2 = scmp.lt.s32.totalorder %s3287_s20, %s3287_s20 }
 0xc06   :  { %p3294_p3 = por %p3293_p2, %p3292_p1 }
 0xc08   :  { %p3295_p4 = pnand %p3294_p3, %p3288_p0 }
 0xc0b   :  { %v3266_v35 = vpop.eup %3265 }
 0xc0c   :  { %v3268_v38 = vpop.eup %3267  ;;  %v2074_v39 = vrot.slane %v3266_v35, 3  ;;  %v2420_v36 = vsel %vm1574_vm11, %v2418_v21, %v3266_v35 }
 0xc0d   :  { %v2075_v37 = vrot.slane %v3268_v38, 2  ;;  %v2421_v40 = vsel %vm1574_vm11, %v2419_v25, %v3268_v38 }
 0xc0f   :  { %v2076_v42 = vsel %vm972_vm8, %v2075_v37, %v2074_v39 }
 0xc10   :  { %3006 = vmatmul.mubr.msk.f32.vlgmr.msra.gmra.mrb[18].mxu0 %vm735_vm7, %v2076_v42 }
 0xc11   :  { %3173 = vmatpush3.bf16.msra.mxu0 %v3607_v34  ;;  %3027 = vmatprep.mubr.msk.f32.mxu0 %vm3312_vm2, %v3311_v1 }
 0xc12   :  { %3174 = vmatprep.subr.bf16.mxu0 %v3313_v13 }
 0xc15   :  { %3176 = vmatpush3.bf16.msra.mxu0 %v3620_v41 }
 0xc16   :  { %3183 = vmatprep.subr.bf16.mxu0 %v3313_v13 }
 0xce3   :  { %v2145_v43 = vpop.f32.mrb[18].mxu0 }
 0xce4   :  { %v2150_v44 = vrot.slane %v2145_v43, 4  ;;  %v2151_v45 = vrot.slane %v2145_v43, 5  ;;  %v3007_v46 = vpop.f32.mrb[19].mxu0 }
 0xce5   :  { %v2584_v46 = vadd.f32 1e-10, %v3391_v56 }
 0xce6   :  { %v2154_v47 = vadd.f32 %v2150_v44, %v3643_v48  ;;  %v2155_v50 = vadd.f32 %v2151_v45, %v3645_v49 }
 0xce8   :  { %3269 = vtanh.f32 %v2154_v47 }
 0xce9   :  { %3271 = vtanh.f32 %v2155_v50 }
 0xcf2   :  { %v3270_v52 = vpop.eup %3269 }
 0xcf3   :  { %v3272_v57 = vpop.eup %3271  ;;  %v2160_v58 = vrot.slane %v3270_v52, 4  ;;  %v2422_v24 = vsel %vm140_vm0, %v2420_v36, %v3270_v52 }
 0xcf4   :  { %v2161_v59 = vrot.slane %v3272_v57, 3  ;;  %v2423_v60 = vsel %vm140_vm0, %v2421_v40, %v3272_v57 }
 0xcf6   :  { %v2162_v61 = vsel %vm972_vm8, %v2161_v59, %v2160_v58 }
 0xcf7   :  { %3017 = vmatmul.mubr.msk.f32.vlgmr.msra.gmra.mrb[18].mxu1 %vm735_vm7, %v2162_v61 }
 0xcf8   :  { %3179 = vmatpush3.bf16.msra.mxu1 %v3607_v34  ;;  %3038 = vmatprep.mubr.msk.f32.mxu1 %vm3312_vm2, %v3311_v1 }
 0xcf9   :  { %3180 = vmatprep.subr.bf16.mxu1 %v3313_v13 }
 0xcfc   :  { %3182 = vmatpush3.bf16.msra.mxu1 %v3620_v41 }
 0xcfd   :  { %3189 = vmatprep.subr.bf16.mxu1 %v3313_v13 }
 0xdca   :  { %v2231_v63 = vpop.f32.mrb[18].mxu1 }
 0xdcb   :  { %v2236_v31 = vrot.slane %v2231_v63, 3  ;;  %v2237_v2 = vrot.slane %v2231_v63, 4  ;;  %v3018_v3 = vpop.f32.mrb[19].mxu1 }
 0xdcd   :  { %v2240_v4 = vadd.f32 %v2236_v31, %v3643_v48  ;;  %v2241_v5 = vadd.f32 %v2237_v2, %v3645_v49 }
 0xdcf   :  { %3273 = vtanh.f32 %v2240_v4 }
 0xdd0   :  { %3275 = vtanh.f32 %v2241_v5 }
 0xdd9   :  { %v3274_v34 = vpop.eup %3273 }
 0xdda   :  { %v3276_v6 = vpop.eup %3275  ;;  %v2246_v7 = vrot.slane %v3274_v34, 5  ;;  %v2424_v8 = vsel %vm1579_vm12, %v2422_v24, %v3274_v34 }
 0xddb   :  { %v2247_v0 = vrot.slane %v3276_v6, 4  ;;  %v2425_v41 = vsel %vm1579_vm12, %v2423_v60, %v3276_v6 }
 0xddd   :  { %v2248_v9 = vsel %vm972_vm8, %v2247_v0, %v2246_v7 }
 0xdde   :  { %3028 = vmatmul.mubr.msk.f32.vlgmr.msra.gmra.mrb[20].mxu0 %vm735_vm7, %v2248_v9 }
 0xddf   :  { %3049 = vmatprep.mubr.msk.f32.mxu0 %vm3312_vm2, %v3311_v1  ;;  %3185 = vmatpush3.bf16.msra.mxu0 %v3184_v30 }
 0xde0   :  { %3186 = vmatprep.subr.bf16.mxu0 %v3313_v13 }
 0xeb1   :  { %v2317_v10 = vpop.f32.mrb[20].mxu0 }
 0xeb2   :  { %v2322_v11 = vrot.slane %v2317_v10, 2  ;;  %v2323_v12 = vrot.slane %v2317_v10, 3  ;;  %v3029_v14 = vpop.f32.mrb[21].mxu0 }
 0xeb4   :  { %v2326_v15 = vadd.f32 %v2322_v11, %v3643_v48  ;;  %v2327_v16 = vadd.f32 %v2323_v12, %v3645_v49 }
 0xeb6   :  { %3277 = vtanh.f32 %v2326_v15 }
 0xeb7   :  { %3279 = vtanh.f32 %v2327_v16 }
 0xec0   :  { %v3278_v17 = vpop.eup %3277 }
 0xec1   :  { %v3280_v18 = vpop.eup %3279  ;;  %v2332_v21 = vrot.slane %v3278_v17, 6  ;;  %v2426_v22 = vsel %vm1582_vm13, %v2424_v8, %v3278_v17 }
 0xec2   :  { %v2333_v23 = vrot.slane %v3280_v18, 5  ;;  %v2427_v25 = vsel %vm1582_vm13, %v2425_v41, %v3280_v18 }
 0xec4   :  { %v2334_v26 = vsel %vm972_vm8, %v2333_v23, %v2332_v21 }
 0xec5   :  { %3039 = vmatmul.mubr.msk.f32.vlgmr.msra.gmra.mrb[20].mxu1 %vm735_vm7, %v2334_v26 }
 0xec6   :  { %3060 = vmatprep.mubr.msk.f32.mxu1 %vm3312_vm2, %v3311_v1  ;;  %3191 = vmatpush3.bf16.msra.mxu1 %v3184_v30  ;;  %v3187_v1 = vpack.c.bf16 %v44_v32, %v43_v29 }
 0xec7   :  { %3192 = vmatprep.subr.bf16.mxu1 %v3313_v13 }
 0xec8   :  { %3188 = vmatpush3.bf16.msra.mxu0 %v3187_v1 }
 0xeca   :  { %3194 = vmatpush3.bf16.msra.mxu1 %v3187_v1 }
 0xf98   :  { %v2403_v33 = vpop.f32.mrb[20].mxu1 }
 0xf99   :  { %v2408_v35 = vrot.slane %v2403_v33, 1  ;;  %v2409_v38 = vrot.slane %v2403_v33, 2  ;;  %v3040_v39 = vpop.f32.mrb[21].mxu1 }
 0xf9b   :  { %v2412_v36 = vadd.f32 %v2408_v35, %v3643_v48  ;;  %v2413_v37 = vadd.f32 %v2409_v38, %v3645_v49  ;;  %v2580_v48 = vsub.s32 0, %v3384_v54 }
 0xf9d   :  { %3281 = vtanh.f32 %v2412_v36  ;;  %v2581_v49 = vrot.slane %v3391_v56, %v2580_v48 }
 0xf9e   :  { %3283 = vtanh.f32 %v2413_v37 }
 0xf9f   :  { %3285 = vrcp.f32 %v2584_v46 }
 0xfa7   :  { %v3282_v40 = vpop.eup %3281 }
 0xfa8   :  { %v3284_v42 = vpop.eup %3283  ;;  %v2428_v43 = vsel %vm133_vm14, %v2426_v22, %v3282_v40 }
 0xfa9   :  { %v2431_v44 = vrot.slane %v2428_v43, 4  ;;  %v2429_v45 = vsel %vm133_vm14, %v2427_v25, %v3284_v42  ;;  %v3286_v47 = vpop.eup %3285 }
 0xfaa   :  { %v2505_v13 = vrot.slane %v2429_v45, 4  ;;  %v2591_v57 = vrot.slane %v3286_v47, %v108_v55 }
 0xfab   :  { %3050 = vmatmul.mubr.msk.f32.vlgmr.msra.gmra.mrb[22].mxu0 %vm735_vm7, %v2431_v44 }
 0xfac   :  { %3061 = vmatmul.mubr.msk.f32.vlgmr.msra.gmra.mrb[22].mxu1 %vm735_vm7, %v2505_v13 }
0x107e   :  { %v2500_v50 = vpop.f32.mrb[22].mxu0 }
0x107f   :  { %v2582_v52 = vadd.f32 %v2581_v49, %v2500_v50  ;;  %v2574_v58 = vpop.f32.mrb[22].mxu1  ;;  %v3051_v24 = vpop.f32.mrb[23].mxu0 }
0x1080   :  { %v2583_v59 = vadd.f32 %v2581_v49, %v2574_v58  ;;  %v3062_v60 = vpop.f32.mrb[23].mxu1 }
0x1081   :  { %v2586_v61 = vsub.f32 %v2582_v52, %v3398_v62 }
0x1082   :  { %v2587_v63 = vsub.f32 %v2583_v59, %v3398_v62 }
0x1083   :  { %v2592_v31 = vmul.f32 %v2591_v57, %v2586_v61 }
0x1084   :  { %v2593_v2 = vmul.f32 %v2591_v57, %v2587_v63 }
0x1085   :  { %v2594_v56 = vmul.f32 %v2592_v31, %v3379_v51 }
0x1086   :  { %v2595_v3 = vmul.f32 %v2593_v2, %v3382_v53 }
0x1087   :  { %v2596_v54 = vadd.f32 %v2594_v56, %v3371_v19 }
0x1088   :  { %v2597_v55 = vadd.f32 %v2595_v3, %v3373_v20 }
0x1089   :  { %2599 = vst.msk [vmem:[#allocation2] sm:$0xf] %vm2598_vm15, %v2596_v54 }
0x108a   :  { %2600 = vst.msk [vmem:[#allocation2 + $0x4] sm:$0xf] %vm2598_vm15, %v2597_v55 }
0x108b   :  { %3298 = shalt.err (!%p3295_p4)
}
0x108c   :  { %s3299_s23 = scalar_lea.hbm %s3769_s5, 128 }
0x108d   :  { %p3300_p5 = scmp.ne.s32.totalorder %s3769_s5, %s3299_s23  ;;  %p3303_p6 = scmp.lt.u32.totalorder %s3299_s23, %s3769_s5 }
0x108f   :  { %p3305_p7 = pnand %p3303_p6, %p3300_p5 }
0x1091   :  { %3308 = shalt.err (!%p3305_p7)
}
0x1092   :  { %s3315_s2 = smov 64   ;;  %s3316_s27 = smov 4  }
0x1093   :  { %2612 = dma.vmem_to_hbm [thread:$0]  %s2607_s19, 128, %s3769_s5, [#allocation3], %s3315_s2, %s3315_s2, %s3316_s27  }
0x1094   :  { %3309 = dma.done.wait [#allocation3], 128  }
0x1095   :  { %3310 = vsyncadd [#allocation3], 4294967168 }
0x1096   :  { %2616 = vsyncpa [#allocation3], 1 }

</bundles_post_ra>
